<compile_context>
chip_gen: v7x
topology: tpu7x:2x2x1
jax: 0.10.0
libtpu: 0.0.40
codegen_flags: <defaults>
</compile_context>

<pallas_src>
import functools

import jax
import jax.numpy as jnp
from jax.experimental import pallas as pl
from jax.experimental.pallas import tpu as pltpu


# ---------------------------------------------------------------------------
# Kernel
# ---------------------------------------------------------------------------
def _swiglu_ffn_kernel(x_ref, w13_ref, w2_ref, o_ref, acc_ref):
    # x_ref:   (tm, dim)       token tile (constant across the k axis)
    # w13_ref: (dim, 2*th)     [w1_k | w3_k] packed hidden tile
    # w2_ref:  (th, dim)       w2^T hidden tile
    # o_ref:   (tm, dim)       output tile (resident across k)
    # acc_ref: (tm, dim) f32   VMEM accumulator
    k = pl.program_id(1)

    @pl.when(k == 0)
    def _():
        acc_ref[...] = jnp.zeros_like(acc_ref)

    th = w2_ref.shape[0]
    # One fused MXU pass for both the gate (w1) and up (w3) projections.
    h13 = jnp.dot(x_ref[...], w13_ref[...],
                  preferred_element_type=jnp.float32)        # (tm, 2*th) f32
    h1 = h13[:, :th]                                         # 128-aligned slice
    h3 = h13[:, th:]
    gated = (h1 * jax.nn.sigmoid(h1)) * h3                   # SiLU gate in f32 (EUP)
    acc_ref[...] += jnp.dot(gated.astype(w2_ref.dtype), w2_ref[...],
                            preferred_element_type=jnp.float32)

    @pl.when(k == pl.num_programs(1) - 1)
    def _():
        o_ref[...] = acc_ref[...].astype(o_ref.dtype)


# ---------------------------------------------------------------------------
# Tile selection & one-time weight packing
# ---------------------------------------------------------------------------
def _pick_token_tile(m, target=256):
    """Largest multiple of 8 dividing m, capped at `target` (full m if tiny)."""
    if m <= target:
        return m
    t = (target // 8) * 8
    while t >= 8:
        if m % t == 0:
            return t
        t -= 8
    return m  # fallback: single full-M tile (block == full array dim)


def _pick_hidden_tile(hidden, target=512):
    """Largest multiple of 128 dividing hidden, capped at `target`."""
    if hidden <= target:
        return hidden
    t = (target // 128) * 128
    while t >= 128:
        if hidden % t == 0:
            return t
        t -= 128
    return hidden  # fallback: full hidden per step


def pack_ffn_weights(w1, w2, w3, th):
    """One-time (load-time) packing.

    Returns:
      w13: (dim, 2*hidden) laid out so hidden-tile k occupies contiguous
           columns [k*2*th : (k+1)*2*th] = [w1_k | w3_k].
      w2t: (hidden, dim) = w2.T
    """
    hidden, dim = w1.shape
    assert hidden % th == 0
    kt = hidden // th
    w1t = w1.T.reshape(dim, kt, th)
    w3t = w3.T.reshape(dim, kt, th)
    w13 = jnp.concatenate([w1t, w3t], axis=2)        # (dim, kt, 2*th)
    return w13.reshape(dim, 2 * hidden), w2.T


# ---------------------------------------------------------------------------
# Pallas wrapper
# ---------------------------------------------------------------------------
@functools.partial(jax.jit, static_argnames=("tm", "th"))
def _ffn_packed(x2d, w13, w2t, *, tm, th):
    m, dim = x2d.shape
    hidden = w2t.shape[0]
    grid = (m // tm, hidden // th)

    return pl.pallas_call(
        _swiglu_ffn_kernel,
        out_shape=jax.ShapeDtypeStruct((m, dim), x2d.dtype),
        grid_spec=pltpu.PrefetchScalarGridSpec(
            num_scalar_prefetch=0,
            grid=grid,
            in_specs=[
                pl.BlockSpec((tm, dim), lambda i, k: (i, 0)),        # x tile
                pl.BlockSpec((dim, 2 * th), lambda i, k: (0, k)),    # [w1_k|w3_k]
                pl.BlockSpec((th, dim), lambda i, k: (k, 0)),        # w2^T tile
            ],
            out_specs=pl.BlockSpec((tm, dim), lambda i, k: (i, 0)),
            scratch_shapes=[pltpu.VMEM((tm, dim), jnp.float32)],
        ),
        compiler_params=pltpu.CompilerParams(
            # Token axis parallel (megacore / v7x 2-TC sharding),
            # hidden reduction axis last and arbitrary (accumulator resident).
            dimension_semantics=("parallel", "arbitrary"),
            vmem_limit_bytes=48 * 1024 * 1024,  # headroom under v7x's 64 MiB
        ),
    )(x2d, w13, w2t)


def feed_forward(x, w1, w2, w3, *, tm=None, th=None):
    """x: (B, S, dim); w1/w3: (hidden, dim); w2: (dim, hidden) -> (B, S, dim)."""
    b, s, dim = x.shape
    hidden = w1.shape[0]
    m = b * s
    if tm is None:
        tm = _pick_token_tile(m)
    if th is None:
        th = _pick_hidden_tile(hidden)
    assert m % tm == 0 and hidden % th == 0
    # TODO(synk): packing runs per call here for demo simplicity; in a real
    # model pack once at weight-load time and reuse the packed arrays.
    w13, w2t = pack_ffn_weights(w1, w2, w3, th)
    out2d = _ffn_packed(x.reshape(m, dim), w13, w2t, tm=tm, th=th)
    return out2d.reshape(b, s, dim)


# ---------------------------------------------------------------------------
# Demo / correctness check
# ---------------------------------------------------------------------------
def _hidden_dim(dim, multiple_of, ffn_dim_multiplier=None):
    hidden = dim * 4
    hidden = int(2 * hidden / 3)
    if ffn_dim_multiplier:
        hidden = int(ffn_dim_multiplier * hidden)
    return multiple_of * ((hidden + multiple_of - 1) // multiple_of)


if __name__ == "__main__":
    # Small ModelArgs-like config: dim=128, multiple_of=128 -> hidden=384.
    batch, seq, dim, multiple_of = 2, 64, 128, 128
    hidden = _hidden_dim(dim, multiple_of)

    key = jax.random.PRNGKey(0)
    kx, k1, k2, k3 = jax.random.split(key, 4)
    x = jax.random.normal(kx, (batch, seq, dim), dtype=jnp.float32)
    w1 = jax.random.normal(k1, (hidden, dim), dtype=jnp.float32) * 0.02
    w2 = jax.random.normal(k2, (dim, hidden), dtype=jnp.float32) * 0.02
    w3 = jax.random.normal(k3, (hidden, dim), dtype=jnp.float32) * 0.02

    # Pure-JAX reference.
    h1 = x @ w1.T
    ref = (h1 * jax.nn.sigmoid(h1) * (x @ w3.T)) @ w2.T

    # 1) Auto-picked tiles (single step on each grid axis at this toy size).
    out = feed_forward(x, w1, w2, w3)
    jax.block_until_ready(out)
    assert out.shape == x.shape
    assert jnp.allclose(out, ref, atol=1e-4, rtol=1e-4)

    # 2) Small explicit tiles: exercises the multi-step token axis and the
    #    hidden-axis reduction with the f32 VMEM accumulator.
    out_tiled = feed_forward(x, w1, w2, w3, tm=64, th=128)
    jax.block_until_ready(out_tiled)
    assert jnp.allclose(out_tiled, ref, atol=1e-4, rtol=1e-4)

    print("KERNEL_OK")
</pallas_src>

<mosaic_0001>
module attributes {stable_mosaic.version = 11 : i64} {
  func.func @_swiglu_ffn_kernel(%arg0: i32, %arg1: i32, %arg2: memref<128x128xf32, #tpu.memory_space<vmem>>, %arg3: memref<128x768xf32, #tpu.memory_space<vmem>>, %arg4: memref<384x128xf32, #tpu.memory_space<vmem>>, %arg5: memref<128x128xf32, #tpu.memory_space<vmem>>, %arg6: memref<128x128xf32, #tpu.memory_space<vmem>>) attributes {dimension_semantics = [#tpu.dimension_semantics<parallel>, #tpu.dimension_semantics<arbitrary>], iteration_bounds = array<i64: 1, 1>, scalar_prefetch = 0 : i64, scratch_operands = 1 : i64, tpu.core_type = #tpu.core_type<tc>, window_params = [{transform_indices = @transform_0, window_bounds = array<i64: 128, 128>}, {transform_indices = @transform_1, window_bounds = array<i64: 128, 768>}, {transform_indices = @transform_2, window_bounds = array<i64: 384, 128>}, {transform_indices = @transform_3, window_bounds = array<i64: 128, 128>}]} {
    %c0_i32 = arith.constant 0 : i32
    %0 = arith.cmpi eq, %arg1, %c0_i32 : i32
    %1 = arith.extui %0 : i1 to i32
    %c0_i32_0 = arith.constant 0 : i32
    %2 = arith.cmpi ne, %1, %c0_i32_0 : i32
    scf.if %2 {
      %cst_14 = arith.constant 0.000000e+00 : f32
      %23 = vector.broadcast %cst_14 : f32 to vector<128x128xf32>
      %c0_15 = arith.constant 0 : index
      %c0_16 = arith.constant 0 : index
      %24 = vector.load %arg6[%c0_15, %c0_16] : memref<128x128xf32, #tpu.memory_space<vmem>>, vector<128x128xf32>
      tpu.vector_store %arg6[%c0_15, %c0_16], %23 {strides = array<i32>} : memref<128x128xf32, #tpu.memory_space<vmem>>, vector<128x128xf32>,
    } else {
    }
    %c0 = arith.constant 0 : index
    %c0_1 = arith.constant 0 : index
    %3 = vector.load %arg2[%c0, %c0_1] : memref<128x128xf32, #tpu.memory_space<vmem>>, vector<128x128xf32>
    %c0_2 = arith.constant 0 : index
    %c0_3 = arith.constant 0 : index
    %4 = vector.load %arg3[%c0_2, %c0_3] : memref<128x768xf32, #tpu.memory_space<vmem>>, vector<128x768xf32>
    %cst = arith.constant dense<0.000000e+00> : vector<128x768xf32>
    %5 = tpu.matmul %3, %4, %cst {dimension_numbers = #tpu.dot_dimension_numbers<[1], [0], [0], [1], [0, 0, 1, 1], [], []>} : vector<128x128xf32>, vector<128x768xf32>, vector<128x768xf32> -> vector<128x768xf32>
    %6 = vector.extract_strided_slice %5 {offsets = [0, 0], sizes = [128, 384], strides = [1, 1]} : vector<128x768xf32> to vector<128x384xf32>
    %7 = vector.extract_strided_slice %5 {offsets = [0, 384], sizes = [128, 384], strides = [1, 1]} : vector<128x768xf32> to vector<128x384xf32>
    %8 = arith.negf %6 : vector<128x384xf32>
    %9 = math.exp %8 : vector<128x384xf32>
    %cst_4 = arith.constant 1.000000e+00 : f32
    %10 = vector.broadcast %cst_4 : f32 to vector<128x384xf32>
    %11 = arith.addf %10, %9 : vector<128x384xf32>
    %12 = arith.divf %10, %11 : vector<128x384xf32>
    %13 = arith.mulf %6, %12 : vector<128x384xf32>
    %14 = arith.mulf %13, %7 : vector<128x384xf32>
    %c0_5 = arith.constant 0 : index
    %c0_6 = arith.constant 0 : index
    %15 = vector.load %arg6[%c0_5, %c0_6] : memref<128x128xf32, #tpu.memory_space<vmem>>, vector<128x128xf32>
    %c0_7 = arith.constant 0 : index
    %c0_8 = arith.constant 0 : index
    %16 = vector.load %arg4[%c0_7, %c0_8] : memref<384x128xf32, #tpu.memory_space<vmem>>, vector<384x128xf32>
    %cst_9 = arith.constant dense<0.000000e+00> : vector<128x128xf32>
    %17 = tpu.matmul %14, %16, %cst_9 {dimension_numbers = #tpu.dot_dimension_numbers<[1], [0], [0], [1], [0, 0, 1, 1], [], []>} : vector<128x384xf32>, vector<384x128xf32>, vector<128x128xf32> -> vector<128x128xf32>
    %18 = arith.addf %15, %17 : vector<128x128xf32>
    %c0_10 = arith.constant 0 : index
    %c0_11 = arith.constant 0 : index
    %19 = vector.load %arg6[%c0_10, %c0_11] : memref<128x128xf32, #tpu.memory_space<vmem>>, vector<128x128xf32>
    tpu.vector_store %arg6[%c0_10, %c0_11], %18 {strides = array<i32>} : memref<128x128xf32, #tpu.memory_space<vmem>>, vector<128x128xf32>,
    %c0_i32_12 = arith.constant 0 : i32
    %20 = arith.cmpi eq, %arg1, %c0_i32_12 : i32
    %21 = arith.extui %20 : i1 to i32
    %c0_i32_13 = arith.constant 0 : i32
    %22 = arith.cmpi ne, %21, %c0_i32_13 : i32
    scf.if %22 {
      %c0_14 = arith.constant 0 : index
      %c0_15 = arith.constant 0 : index
      %23 = vector.load %arg6[%c0_14, %c0_15] : memref<128x128xf32, #tpu.memory_space<vmem>>, vector<128x128xf32>
      %c0_16 = arith.constant 0 : index
      %c0_17 = arith.constant 0 : index
      %24 = vector.load %arg5[%c0_16, %c0_17] : memref<128x128xf32, #tpu.memory_space<vmem>>, vector<128x128xf32>
      tpu.vector_store %arg5[%c0_16, %c0_17], %23 {strides = array<i32>} : memref<128x128xf32, #tpu.memory_space<vmem>>, vector<128x128xf32>,
    } else {
    }
    return
  }
  func.func @transform_0(%arg0: i32, %arg1: i32) -> (i32, i32) {
    %c0_i32 = arith.constant 0 : i32
    %c0_i32_0 = arith.constant 0 : i32
    return %arg0, %c0_i32 : i32, i32
  }
  func.func @transform_1(%arg0: i32, %arg1: i32) -> (i32, i32) {
    %c0_i32 = arith.constant 0 : i32
    %c0_i32_0 = arith.constant 0 : i32
    return %c0_i32, %arg1 : i32, i32
  }
  func.func @transform_2(%arg0: i32, %arg1: i32) -> (i32, i32) {
    %c0_i32 = arith.constant 0 : i32
    %c0_i32_0 = arith.constant 0 : i32
    return %arg1, %c0_i32 : i32, i32
  }
  func.func @transform_3(%arg0: i32, %arg1: i32) -> (i32, i32) {
    %c0_i32 = arith.constant 0 : i32
    %c0_i32_0 = arith.constant 0 : i32
    return %arg0, %c0_i32 : i32, i32
  }
}

</mosaic_0001>

<bundles_post_ra>
// kernel: _ffn_packed.1
= control target key start
LH: loop header
LB: loop body
LE: loop exit
PB: predicated region body
PF: predicated region fallthrough
CT: control target
= control target key end

     0   :  { %8 = vsyncpa [#allocation4], 0  ;;  %s2730_s0 = inlined_call_operand.hbm [shape: f32[128,128], index: 0, kind: input, shape index: {}]   ;;  %s2731_s1 = inlined_call_operand.hbm [shape: f32[128,768], index: 1, kind: input, shape index: {}]   ;;  %s2732_s2 = inlined_call_operand.hbm [shape: f32[384,128], index: 2, kind: input, shape index: {}]   ;;  %s2733_s3 = inlined_call_operand.hbm [shape: f32[128,128], index: 3, kind: output, shape index: {}]  }
   0x1   :  { %9 = vsyncpa [#allocation7], 0 }
   0x2   :  { %10 = vsyncpa [#allocation5], 0  ;;  %s2181_s12 = smov [#allocation6]   ;;  %s2087_s16 = scalar_lea.hbm %s2731_s1, 12288 }
   0x3   :  { %s28_s13 = sshll.u32 %s2181_s12, 4  ;;  %p2088_p0 = scmp.ne.s32.totalorder %s2731_s1, %s2087_s16  ;;  %s29_s13 = int_to_ptr.vmem [resolvable:$true] %s28_s13 }
   0x4   :  { %p2091_p1 = scmp.lt.u32.totalorder %s2087_s16, %s2731_s1 }
   0x6   :  { %p2093_p2 = pnand %p2091_p1, %p2088_p0 }
   0x8   :  { %2096 = shalt.err (!%p2093_p2)
}
   0x9   :  { %s2097_s21 = scalar_lea.vmem %s29_s13, 12288  ;;  %p2102_p4 = scmp.lt.s32.totalorder %s29_s13, %s29_s13 }
   0xa   :  { %p2098_p3 = scmp.ne.s32.totalorder %s29_s13, %s2097_s21  ;;  %p2103_p5 = scmp.lt.s32.totalorder %s2097_s21, %s2097_s21 }
   0xc   :  { %p2104_p6 = por %p2103_p5, %p2102_p4 }
   0xe   :  { %p2105_p7 = pnand %p2104_p6, %p2098_p3 }
  0x10   :  { %2108 = shalt.err (!%p2105_p7)
}
  0x11   :  { %s2182_s22 = smov 768   ;;  %s2183_s23 = smov 48  }
  0x12   :  { %34 = dma.hbm_to_vmem [thread:$0]  %s2731_s1, 12288, %s29_s13, [#allocation7], %s2182_s22, %s2182_s22, %s2183_s23  }
  0x13   :  { %s2184_s26 = smov [#allocation3]   ;;  %s2109_s30 = scalar_lea.hbm %s2730_s0, 2048 }
  0x14   :  { %s16_s27 = sshll.u32 %s2184_s26, 4  ;;  %p2110_p8 = scmp.ne.s32.totalorder %s2730_s0, %s2109_s30  ;;  %s17_s27 = int_to_ptr.vmem [resolvable:$true] %s16_s27 }
  0x15   :  { %p2113_p9 = scmp.lt.u32.totalorder %s2109_s30, %s2730_s0 }
  0x17   :  { %p2115_p10 = pnand %p2113_p9, %p2110_p8 }
  0x19   :  { %2118 = shalt.err (!%p2115_p10)
}
  0x1a   :  { %s2119_s8 = scalar_lea.vmem %s17_s27, 2048  ;;  %p2124_p12 = scmp.lt.s32.totalorder %s17_s27, %s17_s27 }
  0x1b   :  { %p2120_p11 = scmp.ne.s32.totalorder %s17_s27, %s2119_s8  ;;  %p2125_p13 = scmp.lt.s32.totalorder %s2119_s8, %s2119_s8 }
  0x1d   :  { %p2126_p0 = por %p2125_p13, %p2124_p12 }
  0x1f   :  { %p2127_p1 = pnand %p2126_p0, %p2120_p11 }
  0x21   :  { %2130 = shalt.err (!%p2127_p1)
}
  0x22   :  { %s2185_s1 = smov 128   ;;  %s2186_s9 = smov 8  }
  0x23   :  { %22 = dma.hbm_to_vmem [thread:$0]  %s2730_s0, 2048, %s17_s27, [#allocation4], %s2185_s1, %s2185_s1, %s2186_s9  }
  0x24   :  { %s2187_s12 = smov [#allocation8]   ;;  %s2131_s16 = scalar_lea.hbm %s2732_s2, 6144 }
  0x25   :  { %s40_s13 = sshll.u32 %s2187_s12, 4  ;;  %p2132_p2 = scmp.ne.s32.totalorder %s2732_s2, %s2131_s16  ;;  %s41_s13 = int_to_ptr.vmem [resolvable:$true] %s40_s13 }
  0x26   :  { %p2135_p3 = scmp.lt.u32.totalorder %s2131_s16, %s2732_s2 }
  0x28   :  { %p2137_p4 = pnand %p2135_p3, %p2132_p2 }
  0x2a   :  { %2140 = shalt.err (!%p2137_p4)
}
  0x2b   :  { %s2141_s21 = scalar_lea.vmem %s41_s13, 6144  ;;  %p2146_p6 = scmp.lt.s32.totalorder %s41_s13, %s41_s13 }
  0x2c   :  { %p2142_p5 = scmp.ne.s32.totalorder %s41_s13, %s2141_s21  ;;  %p2147_p7 = scmp.lt.s32.totalorder %s2141_s21, %s2141_s21 }
  0x2e   :  { %p2148_p8 = por %p2147_p7, %p2146_p6 }
  0x30   :  { %p2149_p9 = pnand %p2148_p8, %p2142_p5 }
  0x32   :  { %2152 = shalt.err (!%p2149_p9)
}
  0x33   :  { %46 = dma.hbm_to_vmem [thread:$0]  %s2732_s2, 6144, %s41_s13, [#allocation7], %s2185_s1, %s2185_s1, %s2186_s9  }
  0x34   :  { %2175 = dma.done.wait [#allocation4], 2048  }
  0x35   :  { %2176 = vsyncadd [#allocation4], 4294965248 }
  0x36   :  { %2177 = dma.done.wait [#allocation7], 18432  }
  0x37   :  { %2178 = vsyncadd [#allocation7], 4294948864  ;;  %v2188_v0 = vmov 0.0   ;;  %v93_v1 = vld [vmem:[#allocation6 + $0x8] sm:$0xff]  ;;  %v99_v2 = vld [vmem:[#allocation6 + $0x38] sm:$0xff]  ;;  %s2189_s2 = smov [#allocation9]  }
  0x38   :  { %252 = vmatprep.mubr.f32.mxu0 %v2188_v0  ;;  %413 = vmatprep.mubr.f32.mxu1 %v2188_v0  ;;  %v92_v3 = vld [vmem:[#allocation6] sm:$0xff]  ;;  %v1710_v4 = vpack.c.bf16 %v99_v2, %v93_v1  ;;  %v98_v5 = vld [vmem:[#allocation6 + $0x30] sm:$0xff]  ;;  %v105_v6 = vld [vmem:[#allocation6 + $0x68] sm:$0xff]  ;;  %s1481_s23 = sshll.u32 %s2189_s2, 4  ;;  %s1482_s23 = int_to_ptr.vmem [resolvable:$true] %s1481_s23 }
  0x39   :  { %v111_v7 = vld [vmem:[#allocation6 + $0x98] sm:$0xff]  ;;  %v1712_v8 = vpack.c.bf16 %v98_v5, %v92_v3  ;;  %v104_v10 = vld [vmem:[#allocation6 + $0x60] sm:$0xff]  ;;  %v110_v11 = vld [vmem:[#allocation6 + $0x90] sm:$0xff]  ;;  %s2153_s24 = scalar_lea.vmem %s1482_s23, 2048  ;;  %p2158_p11 = scmp.lt.s32.totalorder %s1482_s23, %s1482_s23 }
  0x3a   :  { %v1714_v9 = vpack.c.bf16 %v111_v7, %v105_v6  ;;  %v117_v12 = vld [vmem:[#allocation6 + $0xc8] sm:$0xff]  ;;  %1711 = vmatprep.subr.bf16.mxu0 %v1710_v4  ;;  %v123_v13 = vld [vmem:[#allocation6 + $0xf8] sm:$0xff]  ;;  %v1716_v14 = vpack.c.bf16 %v110_v11, %v104_v10  ;;  %v116_v16 = vld [vmem:[#allocation6 + $0xc0] sm:$0xff]  ;;  %p2154_p10 = scmp.ne.s32.totalorder %s1482_s23, %s2153_s24  ;;  %p2159_p12 = scmp.lt.s32.totalorder %s2153_s24, %s2153_s24 }
  0x3b   :  { %1713 = vmatpush1.bf16.msra.mxu0 %v1712_v8  ;;  %v1718_v15 = vpack.c.bf16 %v123_v13, %v117_v12  ;;  %v122_v17 = vld [vmem:[#allocation6 + $0xf0] sm:$0xff]  ;;  %v129_v18 = vld [vmem:[#allocation6 + $0x128] sm:$0xff]  ;;  %v135_v19 = vld [vmem:[#allocation6 + $0x158] sm:$0xff] }
  0x3c   :  { %1715 = vmatprep.subr.bf16.mxu0 %v1714_v9  ;;  %v1720_v20 = vpack.c.bf16 %v122_v17, %v116_v16  ;;  %v128_v21 = vld [vmem:[#allocation6 + $0x120] sm:$0xff]  ;;  %v1722_v22 = vpack.c.bf16 %v135_v19, %v129_v18  ;;  %v134_v23 = vld [vmem:[#allocation6 + $0x150] sm:$0xff]  ;;  %v95_v24 = vld [vmem:[#allocation6 + $0x18] sm:$0xff]  ;;  %p2160_p13 = por %p2159_p12, %p2158_p11 }
  0x3d   :  { %v101_v25 = vld [vmem:[#allocation6 + $0x48] sm:$0xff]  ;;  %v147_v27 = vld [vmem:[#allocation6 + $0x1b8] sm:$0xff]  ;;  %v94_v29 = vld [vmem:[#allocation6 + $0x10] sm:$0xff]  ;;  %v1724_v31 = vpack.c.bf16 %v134_v23, %v128_v21 }
  0x3e   :  { %v141_v26 = vld [vmem:[#allocation6 + $0x188] sm:$0xff]  ;;  %v1742_v28 = vpack.c.bf16 %v101_v25, %v95_v24  ;;  %v100_v30 = vld [vmem:[#allocation6 + $0x40] sm:$0xff]  ;;  %v107_v34 = vld [vmem:[#allocation6 + $0x78] sm:$0xff]  ;;  %p2161_p0 = pnand %p2160_p13, %p2154_p10 }
  0x3f   :  { %1717 = vmatpush1.bf16.msra.mxu0 %v1716_v14  ;;  %v140_v32 = vld [vmem:[#allocation6 + $0x180] sm:$0xff]  ;;  %v1744_v33 = vpack.c.bf16 %v100_v30, %v94_v29  ;;  %v113_v35 = vld [vmem:[#allocation6 + $0xa8] sm:$0xff]  ;;  %v1726_v36 = vpack.c.bf16 %v147_v27, %v141_v26  ;;  %v146_v37 = vld [vmem:[#allocation6 + $0x1b0] sm:$0xff] }
  0x40   :  { %1719 = vmatprep.subr.bf16.mxu0 %v1718_v15  ;;  %1743 = vmatprep.subr.bf16.mxu1 %v1742_v28  ;;  %v1746_v38 = vpack.c.bf16 %v113_v35, %v107_v34  ;;  %v106_v39 = vld [vmem:[#allocation6 + $0x70] sm:$0xff]  ;;  %v112_v40 = vld [vmem:[#allocation6 + $0xa0] sm:$0xff]  ;;  %v153_v41 = vld [vmem:[#allocation6 + $0x1e8] sm:$0xff]  ;;  %v1728_v46 = vpack.c.bf16 %v146_v37, %v140_v32 }
  0x41   :  { %v159_v42 = vld [vmem:[#allocation6 + $0x218] sm:$0xff]  ;;  %1745 = vmatpush1.bf16.msra.mxu1 %v1744_v33  ;;  %v1748_v43 = vpack.c.bf16 %v112_v40, %v106_v39  ;;  %v125_v45 = vld [vmem:[#allocation6 + $0x108] sm:$0xff]  ;;  %v118_v48 = vld [vmem:[#allocation6 + $0xd0] sm:$0xff] }
  0x42   :  { %1747 = vmatprep.subr.bf16.mxu1 %v1746_v38  ;;  %v119_v44 = vld [vmem:[#allocation6 + $0xd8] sm:$0xff]  ;;  %v124_v49 = vld [vmem:[#allocation6 + $0x100] sm:$0xff]  ;;  %v1730_v51 = vpack.c.bf16 %v159_v42, %v153_v41  ;;  %v158_v53 = vld [vmem:[#allocation6 + $0x210] sm:$0xff] }
  0x43   :  { %1721 = vmatpush1.bf16.msra.mxu0 %v1720_v20  ;;  %v1750_v47 = vpack.c.bf16 %v125_v45, %v119_v44  ;;  %v131_v50 = vld [vmem:[#allocation6 + $0x138] sm:$0xff]  ;;  %v152_v52 = vld [vmem:[#allocation6 + $0x1e0] sm:$0xff]  ;;  %v137_v54 = vld [vmem:[#allocation6 + $0x168] sm:$0xff]  ;;  %v1752_v57 = vpack.c.bf16 %v124_v49, %v118_v48 }
  0x44   :  { %1723 = vmatprep.subr.bf16.mxu0 %v1722_v22  ;;  %v165_v55 = vld [vmem:[#allocation6 + $0x248] sm:$0xff]  ;;  %v171_v56 = vld [vmem:[#allocation6 + $0x278] sm:$0xff]  ;;  %v1754_v58 = vpack.c.bf16 %v137_v54, %v131_v50  ;;  %v130_v59 = vld [vmem:[#allocation6 + $0x130] sm:$0xff]  ;;  %v1732_v61 = vpack.c.bf16 %v158_v53, %v152_v52 }
  0x45   :  { %1749 = vmatpush1.bf16.msra.mxu1 %v1748_v43  ;;  %v136_v60 = vld [vmem:[#allocation6 + $0x160] sm:$0xff]  ;;  %v143_v62 = vld [vmem:[#allocation6 + $0x198] sm:$0xff]  ;;  %v149_v63 = vld [vmem:[#allocation6 + $0x1c8] sm:$0xff]  ;;  %v1734_v1 = vpack.c.bf16 %v171_v56, %v165_v55 }
  0x46   :  { %1751 = vmatprep.subr.bf16.mxu1 %v1750_v47  ;;  %v164_v2 = vld [vmem:[#allocation6 + $0x240] sm:$0xff]  ;;  %v170_v3 = vld [vmem:[#allocation6 + $0x270] sm:$0xff]  ;;  %v177_v4 = vld [vmem:[#allocation6 + $0x2a8] sm:$0xff]  ;;  %v1756_v6 = vpack.c.bf16 %v136_v60, %v130_v59  ;;  %v1758_v7 = vpack.c.bf16 %v149_v63, %v143_v62 }
  0x47   :  { %1725 = vmatpush1.bf16.msra.mxu0 %v1724_v31  ;;  %v183_v5 = vld [vmem:[#allocation6 + $0x2d8] sm:$0xff]  ;;  %v142_v8 = vld [vmem:[#allocation6 + $0x190] sm:$0xff]  ;;  %v148_v9 = vld [vmem:[#allocation6 + $0x1c0] sm:$0xff]  ;;  %v1736_v10 = vpack.c.bf16 %v170_v3, %v164_v2 }
  0x48   :  { %1727 = vmatprep.subr.bf16.mxu0 %v1726_v36  ;;  %v155_v11 = vld [vmem:[#allocation6 + $0x1f8] sm:$0xff]  ;;  %v161_v12 = vld [vmem:[#allocation6 + $0x228] sm:$0xff]  ;;  %v1738_v13 = vpack.c.bf16 %v183_v5, %v177_v4  ;;  %v176_v14 = vld [vmem:[#allocation6 + $0x2a0] sm:$0xff]  ;;  %v1760_v18 = vpack.c.bf16 %v148_v9, %v142_v8 }
  0x49   :  { %1753 = vmatpush1.bf16.msra.mxu1 %v1752_v57  ;;  %v182_v15 = vld [vmem:[#allocation6 + $0x2d0] sm:$0xff]  ;;  %v97_v16 = vld [vmem:[#allocation6 + $0x28] sm:$0xff]  ;;  %v103_v17 = vld [vmem:[#allocation6 + $0x58] sm:$0xff]  ;;  %v1762_v19 = vpack.c.bf16 %v161_v12, %v155_v11 }
  0x4a   :  { %1755 = vmatprep.subr.bf16.mxu1 %v1754_v58  ;;  %v154_v20 = vld [vmem:[#allocation6 + $0x1f0] sm:$0xff]  ;;  %v160_v21 = vld [vmem:[#allocation6 + $0x220] sm:$0xff]  ;;  %v1740_v22 = vpack.c.bf16 %v182_v15, %v176_v14  ;;  %v167_v23 = vld [vmem:[#allocation6 + $0x258] sm:$0xff]  ;;  %v1774_v25 = vpack.c.bf16 %v103_v17, %v97_v16 }
  0x4b   :  { %1729 = vmatpush1.bf16.msra.mxu0 %v1728_v46  ;;  %v173_v24 = vld [vmem:[#allocation6 + $0x288] sm:$0xff]  ;;  %v96_v26 = vld [vmem:[#allocation6 + $0x20] sm:$0xff]  ;;  %v102_v27 = vld [vmem:[#allocation6 + $0x50] sm:$0xff]  ;;  %v1764_v30 = vpack.c.bf16 %v160_v21, %v154_v20 }
  0x4c   :  { %1731 = vmatprep.subr.bf16.mxu0 %v1730_v51  ;;  %v109_v28 = vld [vmem:[#allocation6 + $0x88] sm:$0xff]  ;;  %v115_v29 = vld [vmem:[#allocation6 + $0xb8] sm:$0xff]  ;;  %v1766_v31 = vpack.c.bf16 %v173_v24, %v167_v23  ;;  %v166_v32 = vld [vmem:[#allocation6 + $0x250] sm:$0xff]  ;;  %v1776_v35 = vpack.c.bf16 %v102_v27, %v96_v26 }
  0x4d   :  { %1757 = vmatpush1.bf16.msra.mxu1 %v1756_v6  ;;  %v172_v33 = vld [vmem:[#allocation6 + $0x280] sm:$0xff]  ;;  %v179_v36 = vld [vmem:[#allocation6 + $0x2b8] sm:$0xff]  ;;  %v185_v37 = vld [vmem:[#allocation6 + $0x2e8] sm:$0xff]  ;;  %v1778_v38 = vpack.c.bf16 %v115_v29, %v109_v28 }
  0x4e   :  { %1759 = vmatprep.subr.bf16.mxu1 %v1758_v7  ;;  %v2254_v34 = vld [vmem:[#allocation3] sm:$0xff]  ;;  %v114_v40 = vld [vmem:[#allocation6 + $0xb0] sm:$0xff]  ;;  %v121_v41 = vld [vmem:[#allocation6 + $0xe8] sm:$0xff]  ;;  %v1768_v43 = vpack.c.bf16 %v172_v33, %v166_v32  ;;  %v1770_v44 = vpack.c.bf16 %v185_v37, %v179_v36 }
  0x4f   :  { %1733 = vmatpush1.bf16.msra.mxu0 %v1732_v61  ;;  %v108_v39 = vld [vmem:[#allocation6 + $0x80] sm:$0xff]  ;;  %v127_v42 = vld [vmem:[#allocation6 + $0x118] sm:$0xff]  ;;  %v178_v45 = vld [vmem:[#allocation6 + $0x2b0] sm:$0xff] }
  0x50   :  { %1735 = vmatprep.subr.bf16.mxu0 %v1734_v1  ;;  %v184_v46 = vld [vmem:[#allocation6 + $0x2e0] sm:$0xff]  ;;  %v2258_v47 = vld [vmem:[#allocation3 + $0x8] sm:$0xff]  ;;  %v1780_v48 = vpack.c.bf16 %v114_v40, %v108_v39  ;;  %v1782_v49 = vpack.c.bf16 %v127_v42, %v121_v41  ;;  %v126_v51 = vld [vmem:[#allocation6 + $0x110] sm:$0xff] }
  0x51   :  { %1761 = vmatpush1.bf16.msra.mxu1 %v1760_v18  ;;  %v120_v50 = vld [vmem:[#allocation6 + $0xe0] sm:$0xff]  ;;  %v1772_v52 = vpack.c.bf16 %v184_v46, %v178_v45  ;;  %v133_v53 = vld [vmem:[#allocation6 + $0x148] sm:$0xff]  ;;  %v139_v54 = vld [vmem:[#allocation6 + $0x178] sm:$0xff] }
  0x52   :  { %1763 = vmatprep.subr.bf16.mxu1 %v1762_v19  ;;  %v2262_v55 = vld [vmem:[#allocation3 + $0x10] sm:$0xff]  ;;  %v1784_v56 = vpack.c.bf16 %v126_v51, %v120_v50  ;;  %v1786_v57 = vpack.c.bf16 %v139_v54, %v133_v53  ;;  %v132_v58 = vld [vmem:[#allocation6 + $0x140] sm:$0xff]  ;;  %v145_v60 = vld [vmem:[#allocation6 + $0x1a8] sm:$0xff] }
  0x53   :  { %1737 = vmatpush1.bf16.msra.mxu0 %v1736_v10  ;;  %v138_v59 = vld [vmem:[#allocation6 + $0x170] sm:$0xff]  ;;  %v151_v61 = vld [vmem:[#allocation6 + $0x1d8] sm:$0xff]  ;;  %v144_v2 = vld [vmem:[#allocation6 + $0x1a0] sm:$0xff] }
  0x54   :  { %1739 = vmatprep.subr.bf16.mxu0 %v1738_v13  ;;  %v2266_v62 = vld [vmem:[#allocation3 + $0x18] sm:$0xff]  ;;  %v1788_v63 = vpack.c.bf16 %v138_v59, %v132_v58  ;;  %v1790_v1 = vpack.c.bf16 %v151_v61, %v145_v60  ;;  %v150_v3 = vld [vmem:[#allocation6 + $0x1d0] sm:$0xff]  ;;  %v157_v4 = vld [vmem:[#allocation6 + $0x208] sm:$0xff] }
  0x55   :  { %1765 = vmatpush1.bf16.msra.mxu1 %v1764_v30  ;;  %v163_v5 = vld [vmem:[#allocation6 + $0x238] sm:$0xff]  ;;  %v2272_v6 = vld [vmem:[#allocation3 + $0x20] sm:$0xff]  ;;  %v1792_v7 = vpack.c.bf16 %v150_v3, %v144_v2  ;;  %v162_v10 = vld [vmem:[#allocation6 + $0x230] sm:$0xff] }
  0x56   :  { %1767 = vmatprep.subr.bf16.mxu1 %v1766_v31  ;;  %v1794_v8 = vpack.c.bf16 %v163_v5, %v157_v4  ;;  %v156_v9 = vld [vmem:[#allocation6 + $0x200] sm:$0xff]  ;;  %v169_v11 = vld [vmem:[#allocation6 + $0x268] sm:$0xff]  ;;  %v175_v12 = vld [vmem:[#allocation6 + $0x298] sm:$0xff] }
  0x57   :  { %1741 = vmatpush1.bf16.msra.mxu0 %v1740_v22  ;;  %v2278_v13 = vld [vmem:[#allocation3 + $0x28] sm:$0xff]  ;;  %v1796_v14 = vpack.c.bf16 %v162_v10, %v156_v9  ;;  %v1798_v15 = vpack.c.bf16 %v175_v12, %v169_v11  ;;  %v168_v16 = vld [vmem:[#allocation6 + $0x260] sm:$0xff]  ;;  %v174_v17 = vld [vmem:[#allocation6 + $0x290] sm:$0xff] }
  0x58   :  { %1775 = vmatprep.subr.bf16.mxu0 %v1774_v25  ;;  %v181_v18 = vld [vmem:[#allocation6 + $0x2c8] sm:$0xff]  ;;  %v187_v19 = vld [vmem:[#allocation6 + $0x2f8] sm:$0xff]  ;;  %v2284_v20 = vld [vmem:[#allocation3 + $0x30] sm:$0xff]  ;;  %v1800_v21 = vpack.c.bf16 %v174_v17, %v168_v16 }
  0x59   :  { %1769 = vmatpush1.bf16.msra.mxu1 %v1768_v43  ;;  %v1802_v22 = vpack.c.bf16 %v187_v19, %v181_v18  ;;  %v180_v23 = vld [vmem:[#allocation6 + $0x2c0] sm:$0xff]  ;;  %v186_v24 = vld [vmem:[#allocation6 + $0x2f0] sm:$0xff]  ;;  %v2290_v25 = vld [vmem:[#allocation3 + $0x38] sm:$0xff] }
  0x5a   :  { %253 = vmatmul.mubr.f32.vlgmr.msra.gmra.mrb[0].mxu0 %v2254_v34  ;;  %1771 = vmatprep.subr.bf16.mxu1 %v1770_v44  ;;  %v1804_v26 = vpack.c.bf16 %v186_v24, %v180_v23  ;;  %v84_v27 = vld [vmem:[#allocation3 + $0x40] sm:$0xff]  ;;  %v85_v28 = vld [vmem:[#allocation3 + $0x48] sm:$0xff]  ;;  %v86_v29 = vld [vmem:[#allocation3 + $0x50] sm:$0xff] }
  0x5b   :  { %1777 = vmatpush1.bf16.msra.mxu0 %v1776_v35  ;;  %258 = vmatprep.mubr.f32.mxu0 %v2188_v0  ;;  %v87_v30 = vld [vmem:[#allocation3 + $0x58] sm:$0xff]  ;;  %v88_v31 = vld [vmem:[#allocation3 + $0x60] sm:$0xff]  ;;  %v89_v32 = vld [vmem:[#allocation3 + $0x68] sm:$0xff] }
  0x5c   :  { %1779 = vmatprep.subr.bf16.mxu0 %v1778_v38  ;;  %v90_v33 = vld [vmem:[#allocation3 + $0x70] sm:$0xff]  ;;  %v91_v35 = vld [vmem:[#allocation3 + $0x78] sm:$0xff]  ;;  %v1088_v36 = vld [vmem:[#allocation8 + $0x88] sm:$0xff] }
  0x5d   :  { %1773 = vmatpush1.bf16.msra.mxu1 %v1772_v52  ;;  %v1071_v38 = vld [vmem:[#allocation8] sm:$0xff]  ;;  %v1072_v39 = vld [vmem:[#allocation8 + $0x8] sm:$0xff]  ;;  %v1089_v41 = vld [vmem:[#allocation8 + $0x90] sm:$0xff] }
  0x5e   :  { %259 = vmatmul.mubr.f32.gmra.mrb[2].mxu0 %v2258_v47  ;;  %v1808_v40 = vpack.c.bf16 %v1072_v39, %v1071_v38  ;;  %v1090_v42 = vld [vmem:[#allocation8 + $0x98] sm:$0xff]  ;;  %v1073_v44 = vld [vmem:[#allocation8 + $0x10] sm:$0xff]  ;;  %v1075_v51 = vld [vmem:[#allocation8 + $0x20] sm:$0xff] }
  0x5f   :  { %264 = vmatprep.mubr.f32.mxu0 %v2188_v0  ;;  %1781 = vmatpush1.bf16.msra.mxu0 %v1780_v48  ;;  %v1810_v43 = vpack.c.bf16 %v1090_v42, %v1089_v41  ;;  %v1074_v45 = vld [vmem:[#allocation8 + $0x18] sm:$0xff]  ;;  %v1092_v48 = vld [vmem:[#allocation8 + $0xa8] sm:$0xff]  ;;  %v1077_v58 = vld [vmem:[#allocation8 + $0x30] sm:$0xff] }
  0x60   :  { %1783 = vmatprep.subr.bf16.mxu0 %v1782_v49  ;;  %414 = vmatmul.mubr.f32.vlgmr.msra.gmra.mrb[0].mxu1 %v2254_v34  ;;  %v1812_v46 = vpack.c.bf16 %v1074_v45, %v1073_v44  ;;  %v1103_v49 = vld [vmem:[#allocation8 + $0x100] sm:$0xff]  ;;  %v1076_v52 = vld [vmem:[#allocation8 + $0x28] sm:$0xff]  ;;  %v1078_v59 = vld [vmem:[#allocation8 + $0x38] sm:$0xff] }
  0x61   :  { %419 = vmatprep.mubr.f32.mxu1 %v2188_v0  ;;  %v1104_v53 = vld [vmem:[#allocation8 + $0x108] sm:$0xff]  ;;  %v1816_v54 = vpack.c.bf16 %v1076_v52, %v1075_v51  ;;  %v1820_v60 = vpack.c.bf16 %v1078_v59, %v1077_v58  ;;  %v1105_v61 = vld [vmem:[#allocation8 + $0x110] sm:$0xff]  ;;  %v1079_v4 = vld [vmem:[#allocation8 + $0x40] sm:$0xff] }
  0x62   :  { %265 = vmatmul.mubr.f32.gmra.mrb[4].mxu0 %v2262_v55  ;;  %v1096_v2 = vld [vmem:[#allocation8 + $0xc8] sm:$0xff]  ;;  %v1097_v10 = vld [vmem:[#allocation8 + $0xd0] sm:$0xff]  ;;  %v1098_v11 = vld [vmem:[#allocation8 + $0xd8] sm:$0xff] }
  0x63   :  { %270 = vmatprep.mubr.f32.mxu0 %v2188_v0  ;;  %1785 = vmatpush1.bf16.msra.mxu0 %v1784_v56  ;;  %v1094_v56 = vld [vmem:[#allocation8 + $0xb8] sm:$0xff]  ;;  %v1080_v5 = vld [vmem:[#allocation8 + $0x48] sm:$0xff]  ;;  %v1826_v12 = vpack.c.bf16 %v1098_v11, %v1097_v10  ;;  %v1081_v16 = vld [vmem:[#allocation8 + $0x50] sm:$0xff] }
  0x64   :  { %1787 = vmatprep.subr.bf16.mxu0 %v1786_v57  ;;  %420 = vmatmul.mubr.f32.gmra.mrb[2].mxu1 %v2258_v47  ;;  %v1082_v17 = vld [vmem:[#allocation8 + $0x58] sm:$0xff]  ;;  %v1111_v19 = vld [vmem:[#allocation8 + $0x140] sm:$0xff]  ;;  %v1100_v23 = vld [vmem:[#allocation8 + $0xe8] sm:$0xff] }
  0x65   :  { %425 = vmatprep.mubr.f32.mxu1 %v2188_v0  ;;  %v1828_v18 = vpack.c.bf16 %v1082_v17, %v1081_v16  ;;  %v1116_v38 = vld [vmem:[#allocation8 + $0x168] sm:$0xff]  ;;  %v1118_v41 = vld [vmem:[#allocation8 + $0x178] sm:$0xff] }
  0x66   :  { %271 = vmatmul.mubr.f32.gmra.mrb[6].mxu0 %v2266_v62 }
  0x67   :  { %276 = vmatprep.mubr.f32.mxu0 %v2188_v0  ;;  %1789 = vmatpush1.bf16.msra.mxu0 %v1788_v63 }
  0x68   :  { %1791 = vmatprep.subr.bf16.mxu0 %v1790_v1  ;;  %426 = vmatmul.mubr.f32.gmra.mrb[4].mxu1 %v2262_v55  ;;  %v1095_v1 = vld [vmem:[#allocation8 + $0xc0] sm:$0xff] }
  0x69   :  { %431 = vmatprep.mubr.f32.mxu1 %v2188_v0  ;;  %v1822_v3 = vpack.c.bf16 %v1096_v2, %v1095_v1 }
  0x6a   :  { %277 = vmatmul.mubr.f32.gmra.mrb[8].mxu0 %v2272_v6 }
  0x6b   :  { %282 = vmatprep.mubr.f32.mxu0 %v2188_v0  ;;  %1793 = vmatpush1.bf16.msra.mxu0 %v1792_v7  ;;  %v1107_v7 = vld [vmem:[#allocation8 + $0x120] sm:$0xff] }
  0x6c   :  { %1795 = vmatprep.subr.bf16.mxu0 %v1794_v8  ;;  %432 = vmatmul.mubr.f32.gmra.mrb[6].mxu1 %v2266_v62  ;;  %v1108_v8 = vld [vmem:[#allocation8 + $0x128] sm:$0xff] }
  0x6d   :  { %437 = vmatprep.mubr.f32.mxu1 %v2188_v0  ;;  %v2348_v9 = vpack.c.bf16 %v1108_v8, %v1107_v7 }
  0x6e   :  { %283 = vmatmul.mubr.f32.gmra.mrb[10].mxu0 %v2278_v13 }
  0x6f   :  { %288 = vmatprep.mubr.f32.mxu0 %v2188_v0  ;;  %1797 = vmatpush1.bf16.msra.mxu0 %v1796_v14  ;;  %v1110_v14 = vld [vmem:[#allocation8 + $0x138] sm:$0xff] }
  0x70   :  { %1799 = vmatprep.subr.bf16.mxu0 %v1798_v15  ;;  %438 = vmatmul.mubr.f32.gmra.mrb[8].mxu1 %v2272_v6 }
  0x71   :  { %443 = vmatprep.mubr.f32.mxu1 %v2188_v0 }
  0x72   :  { %289 = vmatmul.mubr.f32.gmra.mrb[12].mxu0 %v2284_v20 }
  0x73   :  { %294 = vmatprep.mubr.f32.mxu0 %v2188_v0  ;;  %1801 = vmatpush1.bf16.msra.mxu0 %v1800_v21 }
  0x74   :  { %1803 = vmatprep.subr.bf16.mxu0 %v1802_v22  ;;  %444 = vmatmul.mubr.f32.gmra.mrb[10].mxu1 %v2278_v13  ;;  %v1099_v22 = vld [vmem:[#allocation8 + $0xe0] sm:$0xff] }
  0x75   :  { %449 = vmatprep.mubr.f32.mxu1 %v2188_v0  ;;  %v1830_v24 = vpack.c.bf16 %v1100_v23, %v1099_v22 }
  0x76   :  { %295 = vmatmul.mubr.f32.gmra.mrb[14].mxu0 %v2290_v25 }
  0x77   :  { %300 = vmatprep.mubr.f32.mxu0 %v2188_v0  ;;  %1805 = vmatpush1.bf16.msra.mxu0 %v1804_v26  ;;  %v1084_v26 = vld [vmem:[#allocation8 + $0x68] sm:$0xff] }
  0x78   :  { %450 = vmatmul.mubr.f32.gmra.mrb[12].mxu1 %v2284_v20 }
  0x79   :  { %455 = vmatprep.mubr.f32.mxu1 %v2188_v0 }
  0x7a   :  { %301 = vmatmul.mubr.f32.gmra.mrb[16].mxu0 %v84_v27 }
  0x7b   :  { %306 = vmatprep.mubr.f32.mxu0 %v2188_v0 }
  0x7c   :  { %456 = vmatmul.mubr.f32.gmra.mrb[14].mxu1 %v2290_v25 }
  0x7d   :  { %461 = vmatprep.mubr.f32.mxu1 %v2188_v0 }
  0x7e   :  { %307 = vmatmul.mubr.f32.gmra.mrb[18].mxu0 %v85_v28 }
  0x7f   :  { %312 = vmatprep.mubr.f32.mxu0 %v2188_v0 }
  0x80   :  { %462 = vmatmul.mubr.f32.gmra.mrb[16].mxu1 %v84_v27 }
  0x81   :  { %467 = vmatprep.mubr.f32.mxu1 %v2188_v0 }
  0x82   :  { %313 = vmatmul.mubr.f32.gmra.mrb[20].mxu0 %v86_v29 }
  0x83   :  { %318 = vmatprep.mubr.f32.mxu0 %v2188_v0 }
  0x84   :  { %468 = vmatmul.mubr.f32.gmra.mrb[18].mxu1 %v85_v28 }
  0x85   :  { %473 = vmatprep.mubr.f32.mxu1 %v2188_v0 }
  0x86   :  { %319 = vmatmul.mubr.f32.gmra.mrb[22].mxu0 %v87_v30 }
  0x87   :  { %324 = vmatprep.mubr.f32.mxu0 %v2188_v0 }
  0x88   :  { %474 = vmatmul.mubr.f32.gmra.mrb[20].mxu1 %v86_v29 }
  0x89   :  { %479 = vmatprep.mubr.f32.mxu1 %v2188_v0 }
  0x8a   :  { %325 = vmatmul.mubr.f32.gmra.mrb[24].mxu0 %v88_v31 }
  0x8b   :  { %330 = vmatprep.mubr.f32.mxu0 %v2188_v0 }
  0x8c   :  { %480 = vmatmul.mubr.f32.gmra.mrb[22].mxu1 %v87_v30 }
  0x8d   :  { %485 = vmatprep.mubr.f32.mxu1 %v2188_v0 }
  0x8e   :  { %331 = vmatmul.mubr.f32.gmra.mrb[26].mxu0 %v89_v32 }
  0x8f   :  { %336 = vmatprep.mubr.f32.mxu0 %v2188_v0 }
  0x90   :  { %486 = vmatmul.mubr.f32.gmra.mrb[24].mxu1 %v88_v31 }
  0x91   :  { %491 = vmatprep.mubr.f32.mxu1 %v2188_v0 }
  0x92   :  { %337 = vmatmul.mubr.f32.gmra.mrb[28].mxu0 %v90_v33 }
  0x93   :  { %342 = vmatprep.mubr.f32.mxu0 %v2188_v0 }
  0x94   :  { %492 = vmatmul.mubr.f32.gmra.mrb[26].mxu1 %v89_v32 }
  0x95   :  { %497 = vmatprep.mubr.f32.mxu1 %v2188_v0 }
  0x96   :  { %343 = vmatmul.mubr.f32.gmra.mrb[30].mxu0 %v91_v35 }
  0x97   :  { %574 = vmatprep.mubr.f32.mxu0 %v2188_v0 }
  0x98   :  { %498 = vmatmul.mubr.f32.gmra.mrb[28].mxu1 %v90_v33 }
  0x99   :  { %503 = vmatprep.mubr.f32.mxu1 %v2188_v0 }
  0x9a   :  { %575 = vmatmul.mubr.f32.vlgmr.msra.gmra.mrb[32].mxu0 %v2254_v34  ;;  %v1087_v34 = vld [vmem:[#allocation8 + $0x80] sm:$0xff] }
  0x9b   :  { %580 = vmatprep.mubr.f32.mxu0 %v2188_v0  ;;  %v1806_v37 = vpack.c.bf16 %v1088_v36, %v1087_v34  ;;  %v1086_v34 = vld [vmem:[#allocation8 + $0x78] sm:$0xff] }
  0x9c   :  { %504 = vmatmul.mubr.f32.gmra.mrb[30].mxu1 %v91_v35 }
  0x9d   :  { %1807 = vmatprep.subr.bf16.mxu1 %v1806_v37  ;;  %v1115_v37 = vld [vmem:[#allocation8 + $0x160] sm:$0xff] }
  0x9e   :  { %581 = vmatmul.mubr.f32.gmra.mrb[34].mxu0 %v2258_v47  ;;  %1809 = vmatpush3.bf16.msra.mxu1 %v1808_v40  ;;  %v1091_v47 = vld [vmem:[#allocation8 + $0xa0] sm:$0xff]  ;;  %v2364_v39 = vpack.c.bf16 %v1116_v38, %v1115_v37  ;;  %v1117_v40 = vld [vmem:[#allocation8 + $0x170] sm:$0xff] }
  0x9f   :  { %586 = vmatprep.mubr.f32.mxu0 %v2188_v0  ;;  %1811 = vmatprep.subr.bf16.mxu1 %v1810_v43  ;;  %v1814_v50 = vpack.c.bf16 %v1092_v48, %v1091_v47  ;;  %v2369_v42 = vpack.c.bf16 %v1118_v41, %v1117_v40 }
  0xa0   :  { %2753 = vst [vmem:[#allocation14_spill] sm:$0xff] %v2364_v39 }
  0xa1   :  { %2754 = vst [vmem:[#allocation15_spill] sm:$0xff] %v2369_v42 }
  0xa2   :  { %587 = vmatmul.mubr.f32.gmra.mrb[36].mxu0 %v2262_v55  ;;  %1813 = vmatpush3.bf16.msra.mxu1 %v1812_v46  ;;  %v2340_v55 = vpack.c.bf16 %v1104_v53, %v1103_v49 }
  0xa3   :  { %592 = vmatprep.mubr.f32.mxu0 %v2188_v0  ;;  %1815 = vmatprep.subr.bf16.mxu1 %v1814_v50 }
  0xa4   :  { %1839 = vmatprep.subr.bf16.mxu0 %v2340_v55 }
  0xa5   :  { %1841 = vmatpush3.bf16.msra.mxu0 %v2340_v55 }
  0xa6   :  { %593 = vmatmul.mubr.f32.gmra.mrb[38].mxu0 %v2266_v62  ;;  %1817 = vmatpush3.bf16.msra.mxu1 %v1816_v54  ;;  %v1106_v62 = vld [vmem:[#allocation8 + $0x118] sm:$0xff] }
  0xa7   :  { %598 = vmatprep.mubr.f32.mxu0 %v2188_v0  ;;  %v2344_v63 = vpack.c.bf16 %v1106_v62, %v1105_v61 }
  0xa9   :  { %1843 = vmatprep.subr.bf16.mxu0 %v2344_v63 }
  0xaa   :  { %599 = vmatmul.mubr.f32.gmra.mrb[40].mxu0 %v2272_v6  ;;  %v1824_v6 = vpack.c.bf16 %v1080_v5, %v1079_v4 }
  0xab   :  { %604 = vmatprep.mubr.f32.mxu0 %v2188_v0  ;;  %1845 = vmatpush3.bf16.msra.mxu0 %v2344_v63 }
  0xac   :  { %1847 = vmatprep.subr.bf16.mxu0 %v2348_v9 }
  0xae   :  { %605 = vmatmul.mubr.f32.gmra.mrb[42].mxu0 %v2278_v13  ;;  %v1109_v13 = vld [vmem:[#allocation8 + $0x130] sm:$0xff] }
  0xaf   :  { %610 = vmatprep.mubr.f32.mxu0 %v2188_v0  ;;  %1849 = vmatpush3.bf16.msra.mxu0 %v2348_v9  ;;  %v2352_v15 = vpack.c.bf16 %v1110_v14, %v1109_v13 }
  0xb1   :  { %1851 = vmatprep.subr.bf16.mxu0 %v2352_v15 }
  0xb2   :  { %611 = vmatmul.mubr.f32.gmra.mrb[44].mxu0 %v2284_v20  ;;  %v1112_v20 = vld [vmem:[#allocation8 + $0x148] sm:$0xff] }
  0xb3   :  { %616 = vmatprep.mubr.f32.mxu0 %v2188_v0  ;;  %1853 = vmatpush3.bf16.msra.mxu0 %v2352_v15  ;;  %v2356_v21 = vpack.c.bf16 %v1112_v20, %v1111_v19 }
  0xb5   :  { %1855 = vmatprep.subr.bf16.mxu0 %v2356_v21 }
  0xb6   :  { %617 = vmatmul.mubr.f32.gmra.mrb[46].mxu0 %v2290_v25  ;;  %v1083_v25 = vld [vmem:[#allocation8 + $0x60] sm:$0xff] }
  0xb7   :  { %622 = vmatprep.mubr.f32.mxu0 %v2188_v0  ;;  %1857 = vmatpush3.bf16.msra.mxu0 %v2356_v21 }
  0xba   :  { %623 = vmatmul.mubr.f32.gmra.mrb[48].mxu0 %v84_v27  ;;  %v1832_v27 = vpack.c.bf16 %v1084_v26, %v1083_v25 }
  0xbb   :  { %628 = vmatprep.mubr.f32.mxu0 %v2188_v0 }
  0xbe   :  { %629 = vmatmul.mubr.f32.gmra.mrb[50].mxu0 %v85_v28  ;;  %v1113_v28 = vld [vmem:[#allocation8 + $0x150] sm:$0xff] }
  0xbf   :  { %634 = vmatprep.mubr.f32.mxu0 %v2188_v0 }
  0xc2   :  { %635 = vmatmul.mubr.f32.gmra.mrb[52].mxu0 %v86_v29  ;;  %v1114_v29 = vld [vmem:[#allocation8 + $0x158] sm:$0xff] }
  0xc3   :  { %640 = vmatprep.mubr.f32.mxu0 %v2188_v0 }
  0xc6   :  { %641 = vmatmul.mubr.f32.gmra.mrb[54].mxu0 %v87_v30  ;;  %v2360_v30 = vpack.c.bf16 %v1114_v29, %v1113_v28 }
  0xc7   :  { %646 = vmatprep.mubr.f32.mxu0 %v2188_v0 }
  0xc8   :  { %2752 = vst [vmem:[#allocation13_spill] sm:$0xff] %v2360_v30  ;;  %1859 = vmatprep.subr.bf16.mxu0 %v2360_v30 }
  0xc9   :  { %1861 = vmatpush3.bf16.msra.mxu0 %v2360_v30 }
  0xca   :  { %647 = vmatmul.mubr.f32.gmra.mrb[56].mxu0 %v88_v31  ;;  %v1101_v31 = vld [vmem:[#allocation8 + $0xf0] sm:$0xff]  ;;  %1863 = vmatprep.subr.bf16.mxu0 %v2364_v39 }
  0xcb   :  { %652 = vmatprep.mubr.f32.mxu0 %v2188_v0 }
  0xcd   :  { %1865 = vmatpush3.bf16.msra.mxu0 %v2364_v39 }
  0xce   :  { %653 = vmatmul.mubr.f32.gmra.mrb[58].mxu0 %v89_v32  ;;  %v1102_v32 = vld [vmem:[#allocation8 + $0xf8] sm:$0xff]  ;;  %1867 = vmatprep.subr.bf16.mxu0 %v2369_v42 }
  0xcf   :  { %658 = vmatprep.mubr.f32.mxu0 %v2188_v0 }
  0xd1   :  { %1869 = vmatpush3.bf16.msra.mxu0 %v2369_v42 }
  0xd2   :  { %659 = vmatmul.mubr.f32.gmra.mrb[60].mxu0 %v90_v33  ;;  %v1834_v33 = vpack.c.bf16 %v1102_v32, %v1101_v31 }
  0xd3   :  { %664 = vmatprep.mubr.f32.mxu0 %v2188_v0  ;;  %v1093_v0 = vld [vmem:[#allocation8 + $0xb0] sm:$0xff] }
  0xd4   :  { %v1818_v57 = vpack.c.bf16 %v1094_v56, %v1093_v0 }
  0xd6   :  { %665 = vmatmul.mubr.f32.gmra.mrb[62].mxu0 %v91_v35  ;;  %1819 = vmatprep.subr.bf16.mxu1 %v1818_v57  ;;  %v1085_v35 = vld [vmem:[#allocation8 + $0x70] sm:$0xff] }
  0xd7   :  { %1821 = vmatpush3.bf16.msra.mxu1 %v1820_v60  ;;  %v1836_v36 = vpack.c.bf16 %v1086_v34, %v1085_v35 }
  0xd8   :  { %1823 = vmatprep.subr.bf16.mxu1 %v1822_v3 }
  0xdb   :  { %1825 = vmatpush3.bf16.msra.mxu1 %v1824_v6 }
  0xdc   :  { %1827 = vmatprep.subr.bf16.mxu1 %v1826_v12 }
  0xdf   :  { %1829 = vmatpush3.bf16.msra.mxu1 %v1828_v18 }
  0xe0   :  { %1831 = vmatprep.subr.bf16.mxu1 %v1830_v24 }
  0xe3   :  { %1833 = vmatpush3.bf16.msra.mxu1 %v1832_v27 }
  0xe4   :  { %1835 = vmatprep.subr.bf16.mxu1 %v1834_v33 }
  0xe7   :  { %1837 = vmatpush3.bf16.msra.mxu1 %v1836_v36 }
  0xe8   :  { %1870 = vmatprep.subr.bf16.mxu1 %v2340_v55 }
 0x12d   :  { %v2373_v43 = vpop.f32.mrb[0].mxu0 }
 0x12e   :  { %v1494_v44 = vmul.f32 -1.442695, %v2373_v43  ;;  %v2376_v45 = vpop.f32.mrb[1].mxu0 }
 0x12f   :  { %v1495_v49 = vmul.f32 -1.442695, %v2376_v45 }
 0x130   :  { %1895 = vpow2.f32 %v1494_v44 }
 0x131   :  { %v2378_v46 = vpop.f32.mrb[2].mxu0 }
 0x132   :  { %v1497_v47 = vmul.f32 -1.442695, %v2378_v46  ;;  %v2381_v48 = vpop.f32.mrb[3].mxu0 }
 0x133   :  { %v1498_v51 = vmul.f32 -1.442695, %v2381_v48  ;;  %v2390_v54 = vpop.f32.mrb[0].mxu1 }
 0x134   :  { %1897 = vpow2.f32 %v1497_v47  ;;  %v417_v0 = vpop.f32.mrb[1].mxu1  ;;  %v1496_v62 = vmul.f32 -1.442695, %v2390_v54 }
 0x135   :  { %v2384_v50 = vpop.f32.mrb[4].mxu0 }
 0x136   :  { %v1500_v52 = vmul.f32 -1.442695, %v2384_v50  ;;  %v2388_v53 = vpop.f32.mrb[5].mxu0 }
 0x137   :  { %v1501_v58 = vmul.f32 -1.442695, %v2388_v53  ;;  %v2399_v1 = vpop.f32.mrb[2].mxu1 }
 0x138   :  { %1899 = vpow2.f32 %v1500_v52  ;;  %v2401_v2 = vpop.f32.mrb[3].mxu1 }
 0x139   :  { %1901 = vpow2.f32 %v1495_v49  ;;  %v2392_v56 = vpop.f32.mrb[6].mxu0 }
 0x13a   :  { %v1896_v57 = vpop.eup %1895  ;;  %1903 = vpow2.f32 %v1498_v51  ;;  %v1503_v59 = vmul.f32 -1.442695, %v2392_v56  ;;  %v2396_v60 = vpop.f32.mrb[7].mxu0 }
 0x13b   :  { %v815_v61 = vadd.f32 1.0, %v1896_v57  ;;  %v1504_v8 = vmul.f32 -1.442695, %v2396_v60  ;;  %v2409_v10 = vpop.f32.mrb[4].mxu1 }
 0x13c   :  { %1905 = vpow2.f32 %v1503_v59  ;;  %v2411_v11 = vpop.f32.mrb[5].mxu1 }
 0x13d   :  { %1907 = vrcp.f32 %v815_v61  ;;  %v2403_v3 = vpop.f32.mrb[8].mxu0 }
 0x13e   :  { %v1898_v4 = vpop.eup %1897  ;;  %1909 = vpow2.f32 %v1501_v58  ;;  %v1506_v5 = vmul.f32 -1.442695, %v2403_v3  ;;  %v2406_v6 = vpop.f32.mrb[9].mxu0 }
 0x13f   :  { %v818_v7 = vadd.f32 1.0, %v1898_v4  ;;  %1911 = vpow2.f32 %v1496_v62  ;;  %v1507_v14 = vmul.f32 -1.442695, %v2406_v6  ;;  %v2420_v22 = vpop.f32.mrb[6].mxu1 }
 0x140   :  { %1913 = vpow2.f32 %v1506_v5  ;;  %v2422_v24 = vpop.f32.mrb[7].mxu1 }
 0x141   :  { %1915 = vrcp.f32 %v818_v7  ;;  %v2413_v12 = vpop.f32.mrb[10].mxu0  ;;  %v1499_v7 = vmul.f32 -1.442695, %v2399_v1 }
 0x142   :  { %v1900_v13 = vpop.eup %1899  ;;  %v1509_v16 = vmul.f32 -1.442695, %v2413_v12  ;;  %v2417_v17 = vpop.f32.mrb[11].mxu0  ;;  %1917 = vpow2.f32 %v1504_v8 }
 0x143   :  { %v1902_v18 = vpop.eup %1901  ;;  %v821_v19 = vadd.f32 1.0, %v1900_v13  ;;  %v1510_v20 = vmul.f32 -1.442695, %v2417_v17  ;;  %v2429_v35 = vpop.f32.mrb[8].mxu1 }
 0x144   :  { %v1904_v23 = vpop.eup %1903  ;;  %1919 = vpow2.f32 %v1509_v16  ;;  %v816_v27 = vadd.f32 1.0, %v1902_v18  ;;  %v2433_v38 = vpop.f32.mrb[9].mxu1 }
 0x145   :  { %1921 = vrcp.f32 %v821_v19  ;;  %v2424_v25 = vpop.f32.mrb[12].mxu0  ;;  %v819_v32 = vadd.f32 1.0, %v1904_v23 }
 0x146   :  { %v1906_v26 = vpop.eup %1905  ;;  %1923 = vpow2.f32 %v1507_v14  ;;  %v1512_v28 = vmul.f32 -1.442695, %v2424_v25  ;;  %v2427_v29 = vpop.f32.mrb[13].mxu0 }
 0x147   :  { %2755 = vst [vmem:[#allocation16_spill] sm:$0xff] %v2427_v29  ;;  %v1908_v31 = vpop.eup %1907  ;;  %v824_v33 = vadd.f32 1.0, %v1906_v26  ;;  %1925 = vpow2.f32 %v1510_v20  ;;  %v1513_v37 = vmul.f32 -1.442695, %v2427_v29  ;;  %v2442_v58 = vpop.f32.mrb[10].mxu1 }
 0x148   :  { %v1910_v34 = vpop.eup %1909  ;;  %v959_v36 = vmul.f32 %v1908_v31, %v2373_v43  ;;  %1927 = vpow2.f32 %v1512_v28  ;;  %2757 = vst [vmem:[#allocation18_spill] sm:$0xff] %v2442_v58  ;;  %v2445_v62 = vpop.f32.mrb[11].mxu1 }
 0x149   :  { %v1912_v40 = vpop.eup %1911  ;;  %1929 = vrcp.f32 %v824_v33  ;;  %v2435_v41 = vpop.f32.mrb[14].mxu0  ;;  %v822_v43 = vadd.f32 1.0, %v1910_v34 }
 0x14a   :  { %v1914_v44 = vpop.eup %1913  ;;  %1931 = vrcp.f32 %v816_v27  ;;  %v1515_v47 = vmul.f32 -1.442695, %v2435_v41  ;;  %v2438_v49 = vmul.f32 %v959_v36, %v417_v0  ;;  %v2440_v51 = vpop.f32.mrb[15].mxu0  ;;  %v817_v61 = vadd.f32 1.0, %v1912_v40 }
 0x14b   :  { %2756 = vst [vmem:[#allocation17_spill] sm:$0xff] %v2440_v51  ;;  %v1916_v52 = vpop.eup %1915  ;;  %1933 = vrcp.f32 %v819_v32  ;;  %v827_v57 = vadd.f32 1.0, %v1914_v44  ;;  %v2456_v18 = vpop.f32.mrb[12].mxu1  ;;  %v1516_v23 = vmul.f32 -1.442695, %v2440_v51 }
 0x14c   :  { %v962_v59 = vmul.f32 %v1916_v52, %v2378_v46  ;;  %1935 = vpow2.f32 %v1513_v37  ;;  %v1918_v4 = vpop.eup %1917  ;;  %2759 = vst [vmem:[#allocation20_spill] sm:$0xff] %v2456_v18  ;;  %v2460_v26 = vpop.f32.mrb[13].mxu1 }
 0x14d   :  { %1937 = vrcp.f32 %v827_v57  ;;  %v2447_v5 = vpop.f32.mrb[16].mxu0  ;;  %v825_v31 = vadd.f32 1.0, %v1918_v4 }
 0x14e   :  { %v1920_v0 = vpop.eup %1919  ;;  %1939 = vpow2.f32 %v1515_v47  ;;  %v2451_v8 = vmul.f32 %v962_v59, %v2401_v2  ;;  %v2453_v13 = vpop.f32.mrb[17].mxu0  ;;  %v1518_v16 = vmul.f32 -1.442695, %v2447_v5  ;;  %v1502_v47 = vmul.f32 -1.442695, %v2409_v10 }
 0x14f   :  { %2758 = vst [vmem:[#allocation19_spill] sm:$0xff] %v2453_v13  ;;  %v1922_v14 = vpop.eup %1921  ;;  %1941 = vrcp.f32 %v822_v43  ;;  %v830_v46 = vadd.f32 1.0, %v1920_v0  ;;  %v2469_v37 = vpop.f32.mrb[14].mxu1 }
 0x150   :  { %v1924_v19 = vpop.eup %1923  ;;  %v965_v20 = vmul.f32 %v1922_v14, %v2384_v50  ;;  %1943 = vrcp.f32 %v817_v61  ;;  %v2475_v52 = vpop.f32.mrb[15].mxu1 }
 0x151   :  { %v1926_v27 = vpop.eup %1925  ;;  %1945 = vrcp.f32 %v830_v46  ;;  %v2462_v2 = vpop.f32.mrb[18].mxu0  ;;  %v828_v36 = vadd.f32 1.0, %v1924_v19 }
 0x152   :  { %v1928_v28 = vpop.eup %1927  ;;  %1947 = vpow2.f32 %v1499_v7  ;;  %v2465_v32 = vmul.f32 %v965_v20, %v2411_v11  ;;  %v2467_v33 = vpop.f32.mrb[19].mxu0  ;;  %v1521_v11 = vmul.f32 -1.442695, %v2462_v2  ;;  %v831_v61 = vadd.f32 1.0, %v1926_v27 }
 0x153   :  { %2760 = vst [vmem:[#allocation21_spill] sm:$0xff] %v2467_v33  ;;  %v1930_v34 = vpop.eup %1929  ;;  %v833_v50 = vadd.f32 1.0, %v1928_v28  ;;  %1949 = vpow2.f32 %v1518_v16  ;;  %v2487_v7 = vpop.f32.mrb[16].mxu1  ;;  %v1519_v16 = vmul.f32 -1.442695, %v2453_v13 }
 0x154   :  { %v2471_v40 = vpop.eup %1931  ;;  %v968_v44 = vmul.f32 %v1930_v34, %v2392_v56  ;;  %1951 = vpow2.f32 %v1516_v23  ;;  %v2491_v19 = vpop.f32.mrb[17].mxu1 }
 0x155   :  { %v2477_v43 = vpop.eup %1933  ;;  %1953 = vrcp.f32 %v833_v50  ;;  %v2480_v57 = vpop.f32.mrb[20].mxu0 }
 0x156   :  { %v1936_v59 = vpop.eup %1935  ;;  %1955 = vrcp.f32 %v825_v31  ;;  %v2483_v4 = vmul.f32 %v968_v44, %v2422_v24  ;;  %v2485_v0 = vpop.f32.mrb[21].mxu0  ;;  %v1505_v24 = vmul.f32 -1.442695, %v2420_v22  ;;  %v1524_v31 = vmul.f32 -1.442695, %v2480_v57 }
 0x157   :  { %2761 = vst [vmem:[#allocation22_spill] sm:$0xff] %v2485_v0  ;;  %v1938_v56 = vpop.eup %1937  ;;  %1957 = vrcp.f32 %v828_v36  ;;  %v834_v50 = vadd.f32 1.0, %v1936_v59  ;;  %v2506_v44 = vpop.f32.mrb[18].mxu1  ;;  %v1508_v59 = vmul.f32 -1.442695, %v2429_v35 }
 0x158   :  { %v1940_v14 = vpop.eup %1939  ;;  %v971_v46 = vmul.f32 %v1938_v56, %v2403_v3  ;;  %1959 = vpow2.f32 %v1502_v47  ;;  %v2509_v56 = vpop.f32.mrb[19].mxu1 }
 0x159   :  { %v2493_v20 = vpop.eup %1941  ;;  %v836_v23 = vadd.f32 1.0, %v1940_v14  ;;  %1961 = vpow2.f32 %v1521_v11  ;;  %v2496_v27 = vpop.f32.mrb[22].mxu0 }
 0x15a   :  { %v2498_v28 = vpop.eup %1943  ;;  %1963 = vrcp.f32 %v831_v61  ;;  %v2502_v3 = vmul.f32 %v971_v46, %v2433_v38  ;;  %v2504_v34 = vpop.f32.mrb[23].mxu0  ;;  %v1522_v61 = vmul.f32 -1.442695, %v2467_v33 }
 0x15b   :  { %2763 = vst [vmem:[#allocation24_spill] sm:$0xff] %v2504_v34  ;;  %v1946_v36 = vpop.eup %1945  ;;  %1965 = vrcp.f32 %v836_v23 }
 0x15c   :  { %2762 = vst [vmem:[#allocation23_spill] sm:$0xff] %v2502_v3  ;;  %v1948_v47 = vpop.eup %1947  ;;  %v974_v11 = vmul.f32 %v1946_v36, %v2413_v12  ;;  %1967 = vpow2.f32 %v1519_v16  ;;  %v2520_v36 = vpop.f32.mrb[20].mxu1 }
 0x15d   :  { %v1950_v14 = vpop.eup %1949  ;;  %1969 = vpow2.f32 %v1505_v24  ;;  %v2512_v13 = vpop.f32.mrb[24].mxu0  ;;  %v820_v16 = vadd.f32 1.0, %v1948_v47 }
 0x15e   :  { %2764 = vst [vmem:[#allocation25_spill] sm:$0xff] %v2512_v13  ;;  %v1952_v38 = vpop.eup %1951  ;;  %v839_v46 = vadd.f32 1.0, %v1950_v14  ;;  %1971 = vpow2.f32 %v1524_v31  ;;  %v2516_v23 = vmul.f32 %v974_v11, %v2445_v62  ;;  %v2518_v42 = vpop.f32.mrb[25].mxu0  ;;  %v1527_v14 = vmul.f32 -1.442695, %v2496_v27 }
 0x15f   :  { %v1954_v12 = vpop.eup %1953  ;;  %1973 = vrcp.f32 %v834_v50  ;;  %v2526_v31 = vpop.f32.mrb[21].mxu1  ;;  %v837_v62 = vadd.f32 1.0, %v1952_v38 }
 0x160   :  { %2765 = vst [vmem:[#allocation26_spill] sm:$0xff] %v2516_v23  ;;  %v2522_v51 = vpop.eup %1955  ;;  %v977_v24 = vmul.f32 %v1954_v12, %v2424_v25  ;;  %1975 = vrcp.f32 %v839_v46  ;;  %v1525_v25 = vmul.f32 -1.442695, %v2485_v0  ;;  %v2538_v46 = vpop.f32.mrb[22].mxu1 }
 0x161   :  { %v2528_v33 = vpop.eup %1957  ;;  %1977 = vpow2.f32 %v1522_v61  ;;  %v2530_v11 = vpop.f32.mrb[26].mxu0  ;;  %2767 = vst [vmem:[#allocation28_spill] sm:$0xff] %v2538_v46 }
 0x162   :  { %v1960_v39 = vpop.eup %1959  ;;  %1979 = vpow2.f32 %v1508_v59  ;;  %v2533_v50 = vmul.f32 %v977_v24, %v2460_v26  ;;  %v2535_v47 = vpop.f32.mrb[27].mxu0  ;;  %v1511_v26 = vmul.f32 -1.442695, %v2442_v58 }
 0x163   :  { %v1962_v23 = vpop.eup %1961  ;;  %1981 = vrcp.f32 %v820_v16  ;;  %v823_v29 = vadd.f32 1.0, %v1960_v39  ;;  %v2542_v61 = vpop.f32.mrb[23].mxu1 }
 0x164   :  { %2766 = vst [vmem:[#allocation27_spill] sm:$0xff] %v2533_v50  ;;  %v2540_v12 = vpop.eup %1963  ;;  %v842_v38 = vadd.f32 1.0, %v1962_v23  ;;  %1983 = vpow2.f32 %v1527_v14  ;;  %v2550_v46 = vpop.f32.mrb[24].mxu1  ;;  %v1530_v14 = vmul.f32 -1.442695, %v2512_v13 }
 0x165   :  { %v1966_v30 = vpop.eup %1965  ;;  %1985 = vrcp.f32 %v837_v62  ;;  %v2545_v59 = vpop.f32.mrb[28].mxu0  ;;  %2768 = vst [vmem:[#allocation29_spill] sm:$0xff] %v2550_v46 }
 0x166   :  { %v1968_v24 = vpop.eup %1967  ;;  %v980_v16 = vmul.f32 %v1966_v30, %v2435_v41  ;;  %1987 = vrcp.f32 %v842_v38  ;;  %v2548_v0 = vpop.f32.mrb[29].mxu0  ;;  %v1528_v41 = vmul.f32 -1.442695, %v2504_v34 }
 0x167   :  { %v1970_v50 = vpop.eup %1969  ;;  %1989 = vpow2.f32 %v1525_v25  ;;  %v2556_v3 = vpop.f32.mrb[25].mxu1  ;;  %v840_v46 = vadd.f32 1.0, %v1968_v24  ;;  %v961_v24 = vmul.f32 %v2498_v28, %v2390_v54 }
 0x168   :  { %v1972_v39 = vpop.eup %1971  ;;  %1991 = vrcp.f32 %v823_v29  ;;  %v826_v23 = vadd.f32 1.0, %v1970_v50  ;;  %v2554_v62 = vmul.f32 %v980_v16, %v2475_v52  ;;  %2770 = vst [vmem:[#allocation31_spill] sm:$0xff] %v2556_v3  ;;  %v2566_v52 = vpop.f32.mrb[26].mxu1  ;;  %v1533_v3 = vmul.f32 -1.442695, %v2530_v11 }
 0x169   :  { %v2558_v58 = vpop.eup %1973  ;;  %v845_v30 = vadd.f32 1.0, %v1972_v39  ;;  %1993 = vpow2.f32 %v1511_v26  ;;  %v2561_v38 = vpop.f32.mrb[30].mxu0  ;;  %2772 = vst [vmem:[#allocation33_spill] sm:$0xff] %v2566_v52  ;;  %v960_v39 = vmul.f32 %v2471_v40, %v2376_v45  ;;  %v1514_v26 = vmul.f32 -1.442695, %v2456_v18 }
 0x16a   :  { %2769 = vst [vmem:[#allocation30_spill] sm:$0xff] %v2554_v62  ;;  %2771 = vst [vmem:[#allocation32_spill] sm:$0xff] %v2558_v58  ;;  %v1976_v25 = vpop.eup %1975  ;;  %1995 = vrcp.f32 %v826_v23  ;;  %v2563_v29 = vpop.f32.mrb[31].mxu0 }
 0x16b   :  { %v1978_v50 = vpop.eup %1977  ;;  %v983_v13 = vmul.f32 %v1976_v25, %v2447_v5  ;;  %1997 = vrcp.f32 %v845_v30  ;;  %v2571_v34 = vpop.f32.mrb[27].mxu1 }
 0x16c   :  { %v1980_v16 = vpop.eup %1979  ;;  %1999 = vpow2.f32 %v1530_v14  ;;  %2773 = vst [vmem:[#allocation34_spill] sm:$0xff] %v2571_v34  ;;  %v843_v18 = vadd.f32 1.0, %v1978_v50  ;;  %v2581_v58 = vpop.f32.mrb[28].mxu1 }
 0x16d   :  { %v1982_v62 = vpop.eup %1981  ;;  %v829_v23 = vadd.f32 1.0, %v1980_v16  ;;  %2001 = vpow2.f32 %v1528_v41  ;;  %v2576_v5 = vmul.f32 %v983_v13, %v2491_v19  ;;  %v576_v30 = vpop.f32.mrb[32].mxu0  ;;  %v963_v13 = vmul.f32 %v2477_v43, %v2381_v48 }
 0x16e   :  { %v1984_v25 = vpop.eup %1983  ;;  %2003 = vrcp.f32 %v840_v46  ;;  %v1008_v45 = vmul.f32 %v960_v39, %v576_v30  ;;  %v578_v40 = vpop.f32.mrb[33].mxu0  ;;  %v1517_v19 = vmul.f32 -1.442695, %v2469_v37  ;;  %v964_v41 = vmul.f32 %v1982_v62, %v2399_v1 }
 0x16f   :  { %v2579_v14 = vpop.eup %1985  ;;  %2005 = vrcp.f32 %v829_v23  ;;  %v848_v34 = vadd.f32 1.0, %v1984_v25  ;;  %v1009_v52 = vmul.f32 %v961_v24, %v578_v40  ;;  %v2586_v28 = vpop.f32.mrb[29].mxu1  ;;  %v1531_v16 = vmul.f32 -1.442695, %v2518_v42 }
 0x170   :  { %v1988_v54 = vpop.eup %1987  ;;  %2007 = vpow2.f32 %v1514_v26  ;;  %1183 = vmatprep.mubr.f32.mxu1 %v1008_v45  ;;  %v1536_v23 = vmul.f32 -1.442695, %v2545_v59 }
 0x171   :  { %v1990_v46 = vpop.eup %1989  ;;  %v986_v50 = vmul.f32 %v1988_v54, %v2462_v2  ;;  %2009 = vrcp.f32 %v848_v34  ;;  %v582_v39 = vpop.f32.mrb[34].mxu0  ;;  %1184 = vmatmul.mubr.f32.vlgmr.msra.gmra.mrb[32].mxu1 %v2438_v49  ;;  %1686 = vmatprep.mubr.f32.mxu0 %v1009_v52 }
 0x172   :  { %v1992_v24 = vpop.eup %1991  ;;  %2011 = vpow2.f32 %v1533_v3  ;;  %v1011_v48 = vmul.f32 %v963_v13, %v582_v39  ;;  %v584_v43 = vpop.f32.mrb[35].mxu0  ;;  %1878 = vmatpush3.bf16.msra.mxu1 %v2340_v55  ;;  %v966_v3 = vmul.f32 %v2493_v20, %v2388_v53  ;;  %v846_v62 = vadd.f32 1.0, %v1990_v46 }
 0x173   :  { %v1994_v26 = vpop.eup %1993  ;;  %2013 = vrcp.f32 %v843_v18  ;;  %v2595_v1 = vmul.f32 %v986_v50, %v2509_v56  ;;  %v1012_v2 = vmul.f32 %v964_v41, %v584_v43  ;;  %1871 = vmatprep.subr.bf16.mxu1 %v2344_v63  ;;  %v2598_v34 = vpop.f32.mrb[30].mxu1  ;;  %v967_v30 = vmul.f32 %v1992_v24, %v2409_v10 }
 0x174   :  { %v1996_v49 = vpop.eup %1995  ;;  %v832_v52 = vadd.f32 1.0, %v1994_v26  ;;  %2015 = vpow2.f32 %v1517_v19  ;;  %1188 = vmatprep.mubr.f32.mxu1 %v1011_v48  ;;  %v2602_v55 = vpop.f32.mrb[31].mxu1  ;;  %v1534_v53 = vmul.f32 -1.442695, %v2535_v47  ;;  %v1520_v10 = vmul.f32 -1.442695, %v2487_v7 }
 0x175   :  { %v1998_v18 = vpop.eup %1997  ;;  %2017 = vpow2.f32 %v1531_v16  ;;  %v588_v56 = vpop.f32.mrb[36].mxu0  ;;  %1189 = vmatmul.mubr.f32.gmra.mrb[34].mxu1 %v2451_v8  ;;  %1687 = vmatmul.mubr.f32.vlgmr.msra.gmra.mrb[64].mxu0 %v1012_v2  ;;  %v1539_v46 = vmul.f32 -1.442695, %v2561_v38  ;;  %v970_v50 = vmul.f32 %v1996_v49, %v2420_v22  ;;  %v972_v22 = vmul.f32 %v2528_v33, %v2406_v6 }
 0x176   :  { %v2000_v25 = vpop.eup %1999  ;;  %v989_v45 = vmul.f32 %v1998_v18, %v2480_v57  ;;  %2019 = vrcp.f32 %v832_v52  ;;  %v1014_v20 = vmul.f32 %v966_v3, %v588_v56  ;;  %v590_v40 = vpop.f32.mrb[37].mxu0  ;;  %1879 = vmatpush3.bf16.msra.mxu1 %v2344_v63  ;;  %v969_v57 = vmul.f32 %v2522_v51, %v2396_v60 }
 0x177   :  { %v2002_v54 = vpop.eup %2001  ;;  %v851_v13 = vadd.f32 1.0, %v2000_v25  ;;  %2021 = vpow2.f32 %v1536_v23  ;;  %v1015_v19 = vmul.f32 %v967_v30, %v590_v40  ;;  %1872 = vmatprep.subr.bf16.mxu1 %v2348_v9  ;;  %v1537_v23 = vmul.f32 -1.442695, %v2548_v0  ;;  %v2775_v40 = vld [vmem:[#allocation23_spill] sm:$0xff] }
 0x178   :  { %v2611_v8 = vpop.eup %2003  ;;  %2023 = vrcp.f32 %v846_v62  ;;  %v2617_v41 = vmul.f32 %v989_v45, %v2526_v31  ;;  %1193 = vmatprep.mubr.f32.mxu1 %v1014_v20  ;;  %v849_v24 = vadd.f32 1.0, %v2002_v54  ;;  %v1523_v6 = vmul.f32 -1.442695, %v2506_v44  ;;  %v2774_v45 = vld [vmem:[#allocation18_spill] sm:$0xff] }
 0x179   :  { %v2006_v63 = vpop.eup %2005  ;;  %2025 = vrcp.f32 %v851_v13  ;;  %v594_v16 = vpop.f32.mrb[38].mxu0  ;;  %1194 = vmatmul.mubr.f32.gmra.mrb[36].mxu1 %v2465_v32  ;;  %1689 = vmatprep.mubr.f32.mxu0 %v1015_v19  ;;  %v1526_v30 = vmul.f32 -1.442695, %v2520_v36  ;;  %v975_v25 = vmul.f32 %v2540_v12, %v2417_v17 }
 0x17a   :  { %v2008_v39 = vpop.eup %2007  ;;  %2027 = vpow2.f32 %v1534_v53  ;;  %v1017_v48 = vmul.f32 %v969_v57, %v594_v16  ;;  %v596_v60 = vpop.f32.mrb[39].mxu0  ;;  %1880 = vmatpush3.bf16.msra.mxu1 %v2348_v9  ;;  %v973_v9 = vmul.f32 %v2006_v63, %v2429_v35  ;;  %v2778_v16 = vld [vmem:[#allocation13_spill] sm:$0xff] }
 0x17b   :  { %v2010_v51 = vpop.eup %2009  ;;  %v835_v43 = vadd.f32 1.0, %v2008_v39  ;;  %2029 = vpow2.f32 %v1520_v10  ;;  %v1018_v31 = vmul.f32 %v970_v50, %v596_v60  ;;  %1873 = vmatprep.subr.bf16.mxu1 %v2352_v15  ;;  %v2776_v10 = vld [vmem:[#allocation28_spill] sm:$0xff] }
 0x17c   :  { %v2012_v26 = vpop.eup %2011  ;;  %v992_v32 = vmul.f32 %v2010_v51, %v2496_v27  ;;  %2031 = vpow2.f32 %v1539_v46  ;;  %1198 = vmatprep.mubr.f32.mxu1 %v1017_v48  ;;  %v1529_v19 = vmul.f32 -1.442695, %v2776_v10  ;;  %v2777_v46 = vld [vmem:[#allocation29_spill] sm:$0xff]  ;;  %v2780_v48 = vld [vmem:[#allocation32_spill] sm:$0xff] }
 0x17d   :  { %v2627_v2 = vpop.eup %2013  ;;  %2033 = vrcp.f32 %v835_v43  ;;  %v854_v49 = vadd.f32 1.0, %v2012_v26  ;;  %v600_v3 = vpop.f32.mrb[40].mxu0  ;;  %1199 = vmatmul.mubr.f32.gmra.mrb[38].mxu1 %v2483_v4  ;;  %1690 = vmatmul.mubr.f32.gmra.mrb[66].mxu0 %v1018_v31  ;;  %v1532_v63 = vmul.f32 -1.442695, %v2777_v46  ;;  %v2781_v51 = vld [vmem:[#allocation25_spill] sm:$0xff] }
 0x17e   :  { %v2016_v62 = vpop.eup %2015  ;;  %2035 = vrcp.f32 %v849_v24  ;;  %v2633_v33 = vmul.f32 %v992_v32, %v2542_v61  ;;  %v1020_v27 = vmul.f32 %v972_v22, %v600_v3  ;;  %v602_v52 = vpop.f32.mrb[41].mxu0  ;;  %1881 = vmatpush3.bf16.msra.mxu1 %v2352_v15  ;;  %v1540_v15 = vmul.f32 -1.442695, %v2563_v29  ;;  %v2779_v24 = vld [vmem:[#allocation16_spill] sm:$0xff]  ;;  %v2782_v26 = vld [vmem:[#allocation33_spill] sm:$0xff]  ;;  %v2783_v32 = vld [vmem:[#allocation26_spill] sm:$0xff] }
 0x17f   :  { %v2018_v18 = vpop.eup %2017  ;;  %2037 = vrcp.f32 %v854_v49  ;;  %v838_v35 = vadd.f32 1.0, %v2016_v62  ;;  %v1021_v56 = vmul.f32 %v973_v9, %v602_v52  ;;  %1874 = vmatprep.subr.bf16.mxu1 %v2356_v21  ;;  %v978_v60 = vmul.f32 %v2780_v48, %v2779_v24  ;;  %v2784_v49 = vld [vmem:[#allocation31_spill] sm:$0xff] }
 0x180   :  { %v2020_v4 = vpop.eup %2019  ;;  %2039 = vpow2.f32 %v1537_v23  ;;  %1203 = vmatprep.mubr.f32.mxu1 %v1020_v27  ;;  %v1535_v22 = vmul.f32 -1.442695, %v2782_v26  ;;  %v852_v52 = vadd.f32 1.0, %v2018_v18 }
 0x181   :  { %v2022_v61 = vpop.eup %2021  ;;  %v976_v53 = vmul.f32 %v2020_v4, %v2774_v45  ;;  %2041 = vrcp.f32 %v838_v35  ;;  %v606_v20 = vpop.f32.mrb[42].mxu0  ;;  %1204 = vmatmul.mubr.f32.gmra.mrb[40].mxu1 %v2775_v40  ;;  %1692 = vmatprep.mubr.f32.mxu0 %v1021_v56  ;;  %v2786_v4 = vld [vmem:[#allocation17_spill] sm:$0xff]  ;;  %v2788_v40 = vld [vmem:[#allocation27_spill] sm:$0xff] }
 0x182   :  { %v2643_v54 = vpop.eup %2023  ;;  %v857_v13 = vadd.f32 1.0, %v2022_v61  ;;  %2043 = vpow2.f32 %v1523_v6  ;;  %v1023_v57 = vmul.f32 %v975_v25, %v606_v20  ;;  %v608_v17 = vpop.f32.mrb[43].mxu0  ;;  %1882 = vmatpush3.bf16.msra.mxu1 %v2356_v21  ;;  %v981_v25 = vmul.f32 %v2579_v14, %v2786_v4  ;;  %v2787_v61 = vld [vmem:[#allocation20_spill] sm:$0xff] }
 0x183   :  { %v2026_v12 = vpop.eup %2025  ;;  %2045 = vpow2.f32 %v1526_v30  ;;  %v1024_v50 = vmul.f32 %v976_v53, %v608_v17  ;;  %1875 = vmatprep.subr.bf16.mxu1 %v2778_v16  ;;  %v2785_v30 = vld [vmem:[#allocation14_spill] sm:$0xff]  ;;  %v1538_v53 = vmul.f32 -1.442695, %v2581_v58  ;;  %v1541_v20 = vmul.f32 -1.442695, %v2598_v34 }
 0x184   :  { %v2028_v39 = vpop.eup %2027  ;;  %v995_v43 = vmul.f32 %v2026_v12, %v2781_v51  ;;  %2047 = vrcp.f32 %v857_v13  ;;  %1208 = vmatprep.mubr.f32.mxu1 %v1023_v57 }
 0x185   :  { %v2030_v31 = vpop.eup %2029  ;;  %2049 = vpow2.f32 %v1540_v15  ;;  %v612_v21 = vpop.f32.mrb[44].mxu0  ;;  %1209 = vmatmul.mubr.f32.gmra.mrb[42].mxu1 %v2783_v32  ;;  %1693 = vmatmul.mubr.f32.gmra.mrb[68].mxu0 %v1024_v50  ;;  %v855_v32 = vadd.f32 1.0, %v2028_v39 }
 0x186   :  { %v2032_v23 = vpop.eup %2031  ;;  %v841_v9 = vadd.f32 1.0, %v2030_v31  ;;  %2051 = vpow2.f32 %v1529_v19  ;;  %v2655_v3 = vmul.f32 %v995_v43, %v2784_v49  ;;  %v1026_v62 = vmul.f32 %v978_v60, %v612_v21  ;;  %v614_v6 = vpop.f32.mrb[45].mxu0  ;;  %1883 = vmatpush3.bf16.msra.mxu1 %v2778_v16  ;;  %v2790_v16 = vld [vmem:[#allocation19_spill] sm:$0xff]  ;;  %v2791_v60 = vld [vmem:[#allocation34_spill] sm:$0xff] }
 0x187   :  { %v2034_v27 = vpop.eup %2033  ;;  %v860_v35 = vadd.f32 1.0, %v2032_v23  ;;  %2053 = vpow2.f32 %v1532_v63  ;;  %1876 = vmatprep.subr.bf16.mxu1 %v2785_v30  ;;  %v2789_v63 = vld [vmem:[#allocation15_spill] sm:$0xff]  ;;  %v984_v24 = vmul.f32 %v2611_v8, %v2790_v16 }
 0x188   :  { %v2659_v56 = vpop.eup %2035  ;;  %v979_v45 = vmul.f32 %v2034_v27, %v2787_v61  ;;  %2055 = vrcp.f32 %v841_v9  ;;  %1213 = vmatprep.mubr.f32.mxu1 %v1026_v62  ;;  %v2793_v27 = vld [vmem:[#allocation21_spill] sm:$0xff] }
 0x189   :  { %v2038_v15 = vpop.eup %2037  ;;  %2057 = vrcp.f32 %v860_v35  ;;  %v618_v18 = vpop.f32.mrb[46].mxu0  ;;  %1214 = vmatmul.mubr.f32.gmra.mrb[44].mxu1 %v2788_v40 }
 0x18a   :  { %v2040_v13 = vpop.eup %2039  ;;  %v998_v19 = vmul.f32 %v2038_v15, %v2530_v11  ;;  %2059 = vpow2.f32 %v1535_v22  ;;  %v1027_v57 = vmul.f32 %v979_v45, %v614_v6  ;;  %v1029_v17 = vmul.f32 %v981_v25, %v618_v18  ;;  %v620_v14 = vpop.f32.mrb[47].mxu0  ;;  %1884 = vmatpush3.bf16.msra.mxu1 %v2785_v30  ;;  %v2792_v22 = vld [vmem:[#allocation30_spill] sm:$0xff] }
 0x18b   :  { %v2042_v12 = vpop.eup %2041  ;;  %2061 = vrcp.f32 %v852_v52  ;;  %1877 = vmatprep.subr.bf16.mxu1 %v2789_v63  ;;  %v987_v52 = vmul.f32 %v2627_v2, %v2793_v27  ;;  %v858_v61 = vadd.f32 1.0, %v2040_v13  ;;  %v2794_v18 = vld [vmem:[#allocation22_spill] sm:$0xff] }
 0x18c   :  { %v2044_v50 = vpop.eup %2043  ;;  %v982_v48 = vmul.f32 %v2042_v12, %v2469_v37  ;;  %v2674_v51 = vmul.f32 %v998_v19, %v2791_v60  ;;  %2063 = vpow2.f32 %v1538_v53  ;;  %1695 = vmatprep.mubr.f32.mxu0 %v1027_v57  ;;  %1218 = vmatprep.mubr.f32.mxu1 %v1029_v17  ;;  %v990_v40 = vmul.f32 %v2643_v54, %v2794_v18 }
 0x18d   :  { %v2046_v11 = vpop.eup %2045  ;;  %v844_v43 = vadd.f32 1.0, %v2044_v50  ;;  %2065 = vpow2.f32 %v1541_v20  ;;  %v624_v31 = vpop.f32.mrb[48].mxu0  ;;  %1219 = vmatmul.mubr.f32.gmra.mrb[46].mxu1 %v2792_v22  ;;  %v2795_v50 = vld [vmem:[#allocation24_spill] sm:$0xff] }
 0x18e   :  { %v2048_v21 = vpop.eup %2047  ;;  %v847_v23 = vadd.f32 1.0, %v2046_v11  ;;  %v1030_v9 = vmul.f32 %v982_v48, %v620_v14  ;;  %v1032_v49 = vmul.f32 %v984_v24, %v624_v31  ;;  %v626_v8 = vpop.f32.mrb[49].mxu0  ;;  %1885 = vmatpush3.bf16.msra.mxu1 %v2789_v63  ;;  %v993_v16 = vmul.f32 %v2659_v56, %v2795_v50 }
 0x18f   :  { %v2050_v37 = vpop.eup %2049  ;;  %v1001_v62 = vmul.f32 %v2048_v21, %v2545_v59  ;;  %2067 = vrcp.f32 %v844_v43 }
 0x190   :  { %v2052_v6 = vpop.eup %2051  ;;  %2069 = vrcp.f32 %v847_v23  ;;  %1696 = vmatmul.mubr.f32.gmra.mrb[70].mxu0 %v1030_v9  ;;  %1223 = vmatprep.mubr.f32.mxu1 %v1032_v49  ;;  %v861_v54 = vadd.f32 1.0, %v2050_v37 }
 0x191   :  { %v2054_v35 = vpop.eup %2053  ;;  %v850_v30 = vadd.f32 1.0, %v2052_v6  ;;  %v2682_v39 = vmul.f32 %v1001_v62, %v2586_v28  ;;  %v630_v4 = vpop.f32.mrb[50].mxu0  ;;  %1224 = vmatmul.mubr.f32.gmra.mrb[48].mxu1 %v2576_v5  ;;  %2071 = vrcp.f32 %v855_v32 }
 0x192   :  { %v2056_v25 = vpop.eup %2055  ;;  %v853_v59 = vadd.f32 1.0, %v2054_v35  ;;  %v1035_v45 = vmul.f32 %v987_v52, %v630_v4  ;;  %v632_v53 = vpop.f32.mrb[51].mxu0 }
 0x193   :  { %v2058_v15 = vpop.eup %2057  ;;  %v985_v2 = vmul.f32 %v2056_v25, %v2487_v7  ;;  %2073 = vrcp.f32 %v850_v30 }
 0x194   :  { %v2060_v20 = vpop.eup %2059  ;;  %v1004_v28 = vmul.f32 %v2058_v15, %v2561_v38  ;;  %2075 = vrcp.f32 %v853_v59  ;;  %1228 = vmatprep.mubr.f32.mxu1 %v1035_v45 }
 0x195   :  { %v2062_v19 = vpop.eup %2061  ;;  %v856_v5 = vadd.f32 1.0, %v2060_v20  ;;  %v2689_v57 = vmul.f32 %v985_v2, %v626_v8  ;;  %v636_v13 = vpop.f32.mrb[52].mxu0  ;;  %1229 = vmatmul.mubr.f32.gmra.mrb[50].mxu1 %v2595_v1  ;;  %2077 = vrcp.f32 %v858_v61 }
 0x196   :  { %v2064_v17 = vpop.eup %2063  ;;  %v2693_v7 = vmul.f32 %v1004_v28, %v2602_v55  ;;  %v1038_v14 = vmul.f32 %v990_v40, %v636_v13  ;;  %v638_v12 = vpop.f32.mrb[53].mxu0  ;;  %v996_v21 = vmul.f32 %v2062_v19, %v2518_v42 }
 0x197   :  { %v2066_v63 = vpop.eup %2065  ;;  %2079 = vrcp.f32 %v856_v5  ;;  %v859_v38 = vadd.f32 1.0, %v2064_v17 }
 0x198   :  { %v862_v24 = vadd.f32 1.0, %v2066_v63  ;;  %1233 = vmatprep.mubr.f32.mxu1 %v1038_v14 }
 0x199   :  { %v2068_v48 = vpop.eup %2067  ;;  %2081 = vrcp.f32 %v859_v38  ;;  %v642_v60 = vpop.f32.mrb[54].mxu0  ;;  %1234 = vmatmul.mubr.f32.gmra.mrb[52].mxu1 %v2617_v41 }
 0x19a   :  { %v2070_v1 = vpop.eup %2069  ;;  %v988_v55 = vmul.f32 %v2068_v48, %v2506_v44  ;;  %v1041_v11 = vmul.f32 %v993_v16, %v642_v60  ;;  %v644_v43 = vpop.f32.mrb[55].mxu0  ;;  %2083 = vrcp.f32 %v861_v54 }
 0x19b   :  { %v991_v31 = vmul.f32 %v2070_v1, %v2520_v36  ;;  %v2072_v22 = vpop.eup %2071  ;;  %2085 = vrcp.f32 %v862_v24 }
 0x19c   :  { %v1036_v56 = vmul.f32 %v988_v55, %v632_v53  ;;  %1238 = vmatprep.mubr.f32.mxu1 %v1041_v11  ;;  %v999_v36 = vmul.f32 %v2072_v22, %v2535_v47 }
 0x19d   :  { %v2074_v32 = vpop.eup %2073  ;;  %v1039_v23 = vmul.f32 %v991_v31, %v638_v12  ;;  %v648_v9 = vpop.f32.mrb[56].mxu0  ;;  %1239 = vmatmul.mubr.f32.gmra.mrb[54].mxu1 %v2633_v33 }
 0x19e   :  { %v2076_v41 = vpop.eup %2075  ;;  %v994_v49 = vmul.f32 %v2074_v32, %v2776_v10  ;;  %v1044_v44 = vmul.f32 %v996_v21, %v648_v9  ;;  %v650_v8 = vpop.f32.mrb[57].mxu0 }
 0x19f   :  { %v997_v37 = vmul.f32 %v2076_v41, %v2777_v46  ;;  %v2078_v62 = vpop.eup %2077 }
 0x1a0   :  { %v1042_v6 = vmul.f32 %v994_v49, %v644_v43  ;;  %1243 = vmatprep.mubr.f32.mxu1 %v1044_v44  ;;  %v1002_v10 = vmul.f32 %v2078_v62, %v2548_v0 }
 0x1a1   :  { %v2080_v42 = vpop.eup %2079  ;;  %v1045_v27 = vmul.f32 %v997_v37, %v650_v8  ;;  %v654_v52 = vpop.f32.mrb[58].mxu0  ;;  %1244 = vmatmul.mubr.f32.gmra.mrb[56].mxu1 %v2655_v3 }
 0x1a2   :  { %v1000_v35 = vmul.f32 %v2080_v42, %v2782_v26  ;;  %v1047_v33 = vmul.f32 %v999_v36, %v654_v52  ;;  %v656_v30 = vpop.f32.mrb[59].mxu0 }
 0x1a3   :  { %v2082_v4 = vpop.eup %2081 }
 0x1a4   :  { %v1048_v25 = vmul.f32 %v1000_v35, %v656_v30  ;;  %1248 = vmatprep.mubr.f32.mxu1 %v1047_v33  ;;  %v2084_v46 = vpop.eup %2083  ;;  %v1003_v61 = vmul.f32 %v2082_v4, %v2581_v58 }
 0x1a5   :  { %v660_v47 = vpop.f32.mrb[60].mxu0  ;;  %1249 = vmatmul.mubr.f32.gmra.mrb[58].mxu1 %v2674_v51  ;;  %v2086_v59 = vpop.eup %2085  ;;  %v1005_v3 = vmul.f32 %v2084_v46, %v2563_v29 }
 0x1a6   :  { %v1050_v45 = vmul.f32 %v1002_v10, %v660_v47  ;;  %v662_v53 = vpop.f32.mrb[61].mxu0  ;;  %v1006_v26 = vmul.f32 %v2086_v59, %v2598_v34 }
 0x1a7   :  { %v1051_v15 = vmul.f32 %v1003_v61, %v662_v53 }
 0x1a8   :  { %1253 = vmatprep.mubr.f32.mxu1 %v1050_v45 }
 0x1a9   :  { %v666_v2 = vpop.f32.mrb[62].mxu0  ;;  %1254 = vmatmul.mubr.f32.gmra.mrb[60].mxu1 %v2682_v39 }
 0x1aa   :  { %v1053_v0 = vmul.f32 %v1005_v3, %v666_v2  ;;  %v668_v20 = vpop.f32.mrb[63].mxu0 }
 0x1ab   :  { %v1054_v18 = vmul.f32 %v1006_v26, %v668_v20 }
 0x1ac   :  { %1258 = vmatprep.mubr.f32.mxu1 %v1053_v0 }
 0x1ad   :  { %1259 = vmatmul.mubr.f32.gmra.mrb[62].mxu1 %v2693_v7 }
 0x1ae   :  { %1698 = vmatprep.mubr.f32.mxu1 %v2689_v57 }
 0x1b1   :  { %1699 = vmatmul.mubr.f32.vlgmr.msra.gmra.mrb[64].mxu1 %v1036_v56 }
 0x1b2   :  { %1701 = vmatprep.mubr.f32.mxu1 %v1039_v23 }
 0x1b5   :  { %1702 = vmatmul.mubr.f32.gmra.mrb[66].mxu1 %v1042_v6 }
 0x1b6   :  { %1704 = vmatprep.mubr.f32.mxu1 %v1045_v27 }
 0x1b9   :  { %1705 = vmatmul.mubr.f32.gmra.mrb[68].mxu1 %v1048_v25 }
 0x1ba   :  { %1707 = vmatprep.mubr.f32.mxu1 %v1051_v15 }
 0x1bd   :  { %1708 = vmatmul.mubr.f32.gmra.mrb[70].mxu1 %v1054_v18 }
 0x244   :  { %v1574_v58 = vpop.f32.mrb[32].mxu1 }
 0x245   :  { %v1575_v29 = vpop.f32.mrb[33].mxu1 }
 0x246   :  { %v1576_v34 = vadd.f32 %v1575_v29, %v1574_v58 }
 0x248   :  { %v1577_v51 = vpop.f32.mrb[34].mxu1  ;;  %v1688_v39 = vpop.f32.mrb[64].mxu0 }
 0x249   :  { %v1578_v40 = vpop.f32.mrb[35].mxu1  ;;  %v1330_v28 = vpop.f32.mrb[65].mxu0 }
 0x24a   :  { %v1579_v19 = vadd.f32 %v1578_v40, %v1577_v51  ;;  %v1331_v5 = vadd.f32 %v1576_v34, %v1330_v28 }
 0x24c   :  { %v1336_v13 = vadd.f32 %v1688_v39, %v1579_v19  ;;  %1460 = vst [vmem:[#allocation9] sm:$0xff] %v1331_v5  ;;  %v1580_v17 = vpop.f32.mrb[36].mxu1 }
 0x24d   :  { %v1581_v57 = vpop.f32.mrb[37].mxu1 }
 0x24e   :  { %1461 = vst [vmem:[#allocation9 + $0x8] sm:$0xff] %v1336_v13  ;;  %v1582_v7 = vadd.f32 %v1581_v57, %v1580_v17 }
 0x250   :  { %v1583_v14 = vpop.f32.mrb[38].mxu1  ;;  %v1691_v12 = vpop.f32.mrb[66].mxu0 }
 0x251   :  { %v1584_v63 = vpop.f32.mrb[39].mxu1  ;;  %v1340_v54 = vpop.f32.mrb[67].mxu0 }
 0x252   :  { %v1585_v38 = vadd.f32 %v1584_v63, %v1583_v14  ;;  %v1341_v50 = vadd.f32 %v1582_v7, %v1340_v54 }
 0x254   :  { %v1346_v16 = vadd.f32 %v1691_v12, %v1585_v38  ;;  %1462 = vst [vmem:[#allocation9 + $0x10] sm:$0xff] %v1341_v50  ;;  %v1586_v24 = vpop.f32.mrb[40].mxu1 }
 0x255   :  { %v1587_v48 = vpop.f32.mrb[41].mxu1 }
 0x256   :  { %1463 = vst [vmem:[#allocation9 + $0x18] sm:$0xff] %v1346_v16  ;;  %v1588_v60 = vadd.f32 %v1587_v48, %v1586_v24 }
 0x258   :  { %v1589_v1 = vpop.f32.mrb[42].mxu1  ;;  %v1694_v55 = vpop.f32.mrb[68].mxu0 }
 0x259   :  { %v1590_v11 = vpop.f32.mrb[43].mxu1  ;;  %v1350_v43 = vpop.f32.mrb[69].mxu0 }
 0x25a   :  { %v1591_v31 = vadd.f32 %v1590_v11, %v1589_v1  ;;  %v1351_v22 = vadd.f32 %v1588_v60, %v1350_v43 }
 0x25c   :  { %v1356_v21 = vadd.f32 %v1694_v55, %v1591_v31  ;;  %1464 = vst [vmem:[#allocation9 + $0x20] sm:$0xff] %v1351_v22  ;;  %v1592_v56 = vpop.f32.mrb[44].mxu1 }
 0x25d   :  { %v1593_v32 = vpop.f32.mrb[45].mxu1 }
 0x25e   :  { %1465 = vst [vmem:[#allocation9 + $0x28] sm:$0xff] %v1356_v21  ;;  %v1594_v23 = vadd.f32 %v1593_v32, %v1592_v56 }
 0x260   :  { %v1595_v9 = vpop.f32.mrb[46].mxu1 }
 0x261   :  { %v1596_v41 = vpop.f32.mrb[47].mxu1 }
 0x262   :  { %v1597_v49 = vadd.f32 %v1596_v41, %v1595_v9 }
 0x263   :  { %v1697_v44 = vpop.f32.mrb[70].mxu0 }
 0x264   :  { %v1366_v8 = vadd.f32 %v1697_v44, %v1597_v49  ;;  %v1360_v37 = vpop.f32.mrb[71].mxu0  ;;  %v1598_v62 = vpop.f32.mrb[48].mxu1 }
 0x265   :  { %v1361_v36 = vadd.f32 %v1594_v23, %v1360_v37  ;;  %v1599_v6 = vpop.f32.mrb[49].mxu1 }
 0x266   :  { %1467 = vst [vmem:[#allocation9 + $0x38] sm:$0xff] %v1366_v8  ;;  %v1600_v42 = vadd.f32 %v1599_v6, %v1598_v62 }
 0x267   :  { %1466 = vst [vmem:[#allocation9 + $0x30] sm:$0xff] %v1361_v36 }
 0x268   :  { %v1601_v27 = vpop.f32.mrb[50].mxu1 }
 0x269   :  { %v1602_v52 = vpop.f32.mrb[51].mxu1 }
 0x26a   :  { %v1603_v35 = vadd.f32 %v1602_v52, %v1601_v27 }
 0x26c   :  { %v1604_v33 = vpop.f32.mrb[52].mxu1 }
 0x26d   :  { %v1605_v30 = vpop.f32.mrb[53].mxu1 }
 0x26e   :  { %v1606_v4 = vadd.f32 %v1605_v30, %v1604_v33 }
 0x270   :  { %v1607_v10 = vpop.f32.mrb[54].mxu1 }
 0x271   :  { %v1608_v25 = vpop.f32.mrb[55].mxu1 }
 0x272   :  { %v1609_v46 = vadd.f32 %v1608_v25, %v1607_v10 }
 0x274   :  { %v1610_v61 = vpop.f32.mrb[56].mxu1 }
 0x275   :  { %v1611_v47 = vpop.f32.mrb[57].mxu1 }
 0x276   :  { %v1612_v59 = vadd.f32 %v1611_v47, %v1610_v61 }
 0x278   :  { %v1613_v45 = vpop.f32.mrb[58].mxu1 }
 0x279   :  { %v1614_v53 = vpop.f32.mrb[59].mxu1 }
 0x27a   :  { %v1615_v15 = vadd.f32 %v1614_v53, %v1613_v45 }
 0x27c   :  { %v1616_v3 = vpop.f32.mrb[60].mxu1 }
 0x27d   :  { %v1617_v26 = vpop.f32.mrb[61].mxu1 }
 0x27e   :  { %v1618_v2 = vadd.f32 %v1617_v26, %v1616_v3 }
 0x280   :  { %v1619_v0 = vpop.f32.mrb[62].mxu1 }
 0x281   :  { %v1620_v20 = vpop.f32.mrb[63].mxu1 }
 0x282   :  { %v1621_v18 = vadd.f32 %v1620_v20, %v1619_v0 }
 0x284   :  { %v1700_v58 = vpop.f32.mrb[64].mxu1 }
 0x285   :  { %v1376_v29 = vadd.f32 %v1700_v58, %v1603_v35  ;;  %v1370_v34 = vpop.f32.mrb[65].mxu1 }
 0x286   :  { %v1371_v51 = vadd.f32 %v1600_v42, %v1370_v34 }
 0x287   :  { %1469 = vst [vmem:[#allocation9 + $0x48] sm:$0xff] %v1376_v29 }
 0x288   :  { %1468 = vst [vmem:[#allocation9 + $0x40] sm:$0xff] %v1371_v51  ;;  %v1703_v39 = vpop.f32.mrb[66].mxu1 }
 0x289   :  { %v1386_v40 = vadd.f32 %v1703_v39, %v1609_v46  ;;  %v1380_v28 = vpop.f32.mrb[67].mxu1 }
 0x28a   :  { %v1381_v19 = vadd.f32 %v1606_v4, %v1380_v28 }
 0x28b   :  { %1471 = vst [vmem:[#allocation9 + $0x58] sm:$0xff] %v1386_v40 }
 0x28c   :  { %1470 = vst [vmem:[#allocation9 + $0x50] sm:$0xff] %v1381_v19  ;;  %v1706_v5 = vpop.f32.mrb[68].mxu1 }
 0x28d   :  { %v1396_v13 = vadd.f32 %v1706_v5, %v1615_v15  ;;  %v1390_v17 = vpop.f32.mrb[69].mxu1 }
 0x28e   :  { %v1391_v57 = vadd.f32 %v1612_v59, %v1390_v17 }
 0x28f   :  { %1473 = vst [vmem:[#allocation9 + $0x68] sm:$0xff] %v1396_v13 }
 0x290   :  { %1472 = vst [vmem:[#allocation9 + $0x60] sm:$0xff] %v1391_v57  ;;  %v1709_v7 = vpop.f32.mrb[70].mxu1 }
 0x291   :  { %v1406_v14 = vadd.f32 %v1709_v7, %v1621_v18  ;;  %v1400_v12 = vpop.f32.mrb[71].mxu1 }
 0x292   :  { %v1401_v63 = vadd.f32 %v1618_v2, %v1400_v12 }
 0x293   :  { %1475 = vst [vmem:[#allocation9 + $0x78] sm:$0xff] %v1406_v14 }
 0x294   :  { %1474 = vst [vmem:[#allocation9 + $0x70] sm:$0xff] %v1401_v63 }
 0x295   :  { %2164 = shalt.err (!%p2161_p0)
}
 0x296   :  { %s2165_s27 = scalar_lea.hbm %s2733_s3, 2048 }
 0x297   :  { %p2166_p1 = scmp.ne.s32.totalorder %s2733_s3, %s2165_s27  ;;  %p2169_p2 = scmp.lt.u32.totalorder %s2165_s27, %s2733_s3 }
 0x299   :  { %p2171_p3 = pnand %p2169_p2, %p2166_p1 }
 0x29b   :  { %2174 = shalt.err (!%p2171_p3)
}
 0x29c   :  { %1487 = dma.vmem_to_hbm [thread:$0]  %s1482_s23, 2048, %s2733_s3, [#allocation5], %s2185_s1, %s2185_s1, %s2186_s9  }
 0x29d   :  { %2179 = dma.done.wait [#allocation5], 2048  }
 0x29e   :  { %2180 = vsyncadd [#allocation5], 4294965248 }
 0x29f   :  { %1491 = vsyncpa [#allocation4], 1 }
 0x2a0   :  { %1492 = vsyncpa [#allocation7], 1 }
 0x2a1   :  { %1493 = vsyncpa [#allocation5], 1 }

</bundles_post_ra>
